<compile_context>
chip_gen: v7x
topology: tpu7x:2x2x1
jax: 0.10.0
libtpu: 0.0.40
codegen_flags: <defaults>
</compile_context>

<pallas_src>
import functools

import jax
import jax.numpy as jnp
from jax.experimental import pallas as pl
from jax.experimental.pallas import tpu as pltpu


def _round_up(n, m):
    return ((n + m - 1) // m) * m


# ----------------------------- fused Pallas kernel -------------------------- #

def _lstm_net_kernel(*refs, n_layers, hp):
    """One timestep of the whole LSTMNet (grid axis 0 = time).

    Ref layout (inputs, then outputs, then scratch):
      inputs : x_seq(1,Bp,Vp bf16), h0_0,c0_0,...,h0_{L-1},c0_{L-1} (f32),
               wh_0,wx_0,b_0, ..., wh_{L-1},wx_{L-1},b_{L-1}, w_dec, b_dec
      outputs: log_probs(1,Bp,Vp f32), h_out_0,c_out_0,... (f32, resident)
      scratch: h_scr (n_layers,Bp,Hp) bf16 recurrent carry
    wh_i/wx_i are bf16 with gate order [f, i, o, g] on the 4*Hp axis; b_i is the
    summed f32 bias (1, 4*Hp).  b_dec holds -1e30 in padded vocab lanes.
    """
    n_in = 1 + 2 * n_layers + 3 * n_layers + 2
    n_out = 1 + 2 * n_layers
    in_refs = refs[:n_in]
    out_refs = refs[n_in:n_in + n_out]
    h_scr = refs[n_in + n_out]                      # (L, Bp, Hp) bf16

    x_ref = in_refs[0]
    h0_refs = [in_refs[1 + 2 * i] for i in range(n_layers)]
    c0_refs = [in_refs[2 + 2 * i] for i in range(n_layers)]
    base = 1 + 2 * n_layers
    wh_refs = [in_refs[base + 3 * i + 0] for i in range(n_layers)]
    wx_refs = [in_refs[base + 3 * i + 1] for i in range(n_layers)]
    b_refs = [in_refs[base + 3 * i + 2] for i in range(n_layers)]
    wd_ref, bd_ref = in_refs[-2], in_refs[-1]

    logp_ref = out_refs[0]
    h_out_refs = [out_refs[1 + 2 * i] for i in range(n_layers)]
    c_out_refs = [out_refs[2 + 2 * i] for i in range(n_layers)]

    t = pl.program_id(0)

    @pl.when(t == 0)
    def _init():
        for i in range(n_layers):
            h_scr[i] = h0_refs[i][...].astype(jnp.bfloat16)
            c_out_refs[i][...] = c0_refs[i][...]     # f32 cell carry (resident)

    inp = x_ref[0]                                   # (Bp, Vp) bf16, no recast
    for i in range(n_layers):
        # Two accumulated MXU dots (bf16 operands, f32 accumulation) — no
        # concat / no extra materialized buffer on the serial layer chain.
        gates = (
            jnp.dot(h_scr[i], wh_refs[i][...], preferred_element_type=jnp.float32)
            + jnp.dot(inp, wx_refs[i][...], preferred_element_type=jnp.float32)
            + b_refs[i][...])
        # Fused sigmoid over the stacked [f, i, o] slab; tanh for g.
        sig = jax.nn.sigmoid(gates[:, 0:3 * hp])
        f = sig[:, 0 * hp:1 * hp]
        ig = sig[:, 1 * hp:2 * hp]
        o = sig[:, 2 * hp:3 * hp]
        g = jnp.tanh(gates[:, 3 * hp:4 * hp])
        c_new = f * c_out_refs[i][...] + ig * g      # f32 cell update
        h_new = o * jnp.tanh(c_new)                  # f32
        c_out_refs[i][...] = c_new                   # resident output = carry
        h_out_refs[i][...] = h_new
        h_bf = h_new.astype(jnp.bfloat16)            # cast exactly once
        h_scr[i] = h_bf                              # bf16 recurrent carry
        inp = h_bf                                   # bf16 inter-layer input

    # Decoder + temperature + log-softmax, lane-dense (Bp, Vp) output.
    logits = (jnp.dot(inp, wd_ref[...], preferred_element_type=jnp.float32)
              + bd_ref[...])
    s = logits * 1.25                                # == logits / 0.8
    m = jnp.max(s, axis=-1, keepdims=True)
    z = s - m
    lse = jnp.log(jnp.sum(jnp.exp(z), axis=-1, keepdims=True))
    logp_ref[0] = z - lse


# ------------------------------ pallas_call glue ---------------------------- #

def lstm_net_forward_seq(packed, x_seq, hidden_states, cell_states):
    """Runs T sequential LSTMNet.forward steps in a single pallas_call.

    x_seq: (T, B, V) f32.  Returns (log_probs (T,B,V), final hidden list,
    final cell list) — identical to feeding the per-step outputs back into
    the PyTorch forward T times.
    """
    n_layers = len(packed["layers"])
    T, B, V = x_seq.shape
    H = hidden_states[0].shape[1]
    Bp = _round_up(B, 8)
    Hp = _round_up(H, 128)
    Vp = _round_up(V, 128)

    # Pre-cast padded input sequence to bf16 (MXU operand dtype).
    x_p = jnp.pad(x_seq, ((0, 0), (0, Bp - B), (0, Vp - V))).astype(jnp.bfloat16)

    hc_p = []
    for i in range(n_layers):
        hc_p.append(jnp.pad(hidden_states[i], ((0, Bp - B), (0, Hp - H))))
        hc_p.append(jnp.pad(cell_states[i], ((0, Bp - B), (0, Hp - H))))

    w_in, w_specs = [], []
    for i, layer in enumerate(packed["layers"]):
        in_p = Vp if i == 0 else Hp
        w_in.extend([layer["wh"], layer["wx"], layer["b"]])
        w_specs.extend([
            pl.BlockSpec((Hp, 4 * Hp), lambda t: (0, 0)),
            pl.BlockSpec((in_p, 4 * Hp), lambda t: (0, 0)),
            pl.BlockSpec((1, 4 * Hp), lambda t: (0, 0)),
        ])

    inputs = ([x_p] + hc_p + w_in
              + [packed["decoder"]["w"], packed["decoder"]["b"]])

    in_specs = (
        [pl.BlockSpec((1, Bp, Vp), lambda t: (t, 0, 0))]
        + [pl.BlockSpec((Bp, Hp), lambda t: (0, 0))] * (2 * n_layers)
        + w_specs
        + [pl.BlockSpec((Hp, Vp), lambda t: (0, 0)),
           pl.BlockSpec((1, Vp), lambda t: (0, 0))])

    out_shape = tuple(
        [jax.ShapeDtypeStruct((T, Bp, Vp), jnp.float32)]
        + [jax.ShapeDtypeStruct((Bp, Hp), jnp.float32)] * (2 * n_layers))
    out_specs = tuple(
        [pl.BlockSpec((1, Bp, Vp), lambda t: (t, 0, 0))]
        + [pl.BlockSpec((Bp, Hp), lambda t: (0, 0))] * (2 * n_layers))

    kernel = functools.partial(_lstm_net_kernel, n_layers=n_layers, hp=Hp)
    outs = pl.pallas_call(
        kernel,
        out_shape=out_shape,
        grid_spec=pltpu.PrefetchScalarGridSpec(
            num_scalar_prefetch=0,
            grid=(T,),
            in_specs=in_specs,
            out_specs=out_specs,
            scratch_shapes=[pltpu.VMEM((n_layers, Bp, Hp), jnp.bfloat16)]),
        compiler_params=pltpu.CompilerParams(
            dimension_semantics=("arbitrary",)),   # time is a true recurrence
    )(*inputs)

    log_probs = outs[0][:, :B, :V]
    h_final = [outs[1 + 2 * i][:B, :H] for i in range(n_layers)]
    c_final = [outs[2 + 2 * i][:B, :H] for i in range(n_layers)]
    return log_probs, h_final, c_final


def lstm_net_forward(packed, x, hidden_states, cell_states):
    """Exact mirror of LSTMNet.forward (one step): (log_probs, outputs, cstates)."""
    log_probs, h_final, c_final = lstm_net_forward_seq(
        packed, x[None], hidden_states, cell_states)
    return log_probs[0], h_final, c_final


# ------------------------------ parameters --------------------------------- #

def init_params(key, vocab_size, hidden_size, n_layers):
    """Per-gate Linear params mimicking the PyTorch module (U(-1/sqrt(fan_in)))."""
    def linear(k, fan_in, fan_out):
        k1, k2 = jax.random.split(k)
        bound = 1.0 / float(fan_in) ** 0.5
        w = jax.random.uniform(k1, (fan_in, fan_out), jnp.float32, -bound, bound)
        b = jax.random.uniform(k2, (fan_out,), jnp.float32, -bound, bound)
        return w, b

    params = {"layers": []}
    for i in range(n_layers):
        in_dim = vocab_size if i == 0 else hidden_size
        key, *subs = jax.random.split(key, 9)
        layer = {"wh": [], "bh": [], "wx": [], "bx": []}
        for g in range(4):  # gate order: f, i, o, g
            wh, bh = linear(subs[g], hidden_size, hidden_size)
            wx, bx = linear(subs[4 + g], in_dim, hidden_size)
            layer["wh"].append(wh); layer["bh"].append(bh)
            layer["wx"].append(wx); layer["bx"].append(bx)
        params["layers"].append(layer)
    key, kd = jax.random.split(key)
    wd, bd = linear(kd, hidden_size, vocab_size)
    params["decoder"] = {"w": wd, "b": bd}
    return params


def pack_params(params, vocab_size, hidden_size):
    """Fuse per-gate Linears into split padded bf16 weights:
    wh (Hp, 4*Hp), wx (in_p, 4*Hp), summed f32 bias (1, 4*Hp), plus padded
    bf16 decoder weight and f32 decoder bias (-1e30 in padded vocab lanes)."""
    H = hidden_size
    Hp = _round_up(H, 128)
    Vp = _round_up(vocab_size, 128)
    packed = {"layers": []}
    for i, layer in enumerate(params["layers"]):
        in_dim = vocab_size if i == 0 else H
        in_p = Vp if i == 0 else Hp
        wh_blocks, wx_blocks, b_blocks = [], [], []
        for g in range(4):  # [f, i, o, g]
            wh_blocks.append(jnp.pad(layer["wh"][g], ((0, Hp - H), (0, Hp - H))))
            wx_blocks.append(jnp.pad(layer["wx"][g], ((0, in_p - in_dim), (0, Hp - H))))
            b_blocks.append(jnp.pad(layer["bh"][g] + layer["bx"][g], (0, Hp - H)))
        packed["layers"].append({
            "wh": jnp.concatenate(wh_blocks, axis=1).astype(jnp.bfloat16),
            "wx": jnp.concatenate(wx_blocks, axis=1).astype(jnp.bfloat16),
            "b": jnp.concatenate(b_blocks).reshape(1, -1),          # f32 (1, 4*Hp)
        })
    wd_p = jnp.pad(params["decoder"]["w"], ((0, Hp - H), (0, Vp - vocab_size)))
    bd_p = jnp.concatenate([params["decoder"]["b"],
                            jnp.full((Vp - vocab_size,), -1e30, jnp.float32)])
    packed["decoder"] = {"w": wd_p.astype(jnp.bfloat16), "b": bd_p.reshape(1, -1)}
    return packed


# ------------------------------ reference ----------------------------------- #

def reference_step(params, x, hidden_states, cell_states):
    """Pure-JAX f32 mirror of one PyTorch LSTMNet.forward call."""
    outputs, cstates = [], []
    for i, layer in enumerate(params["layers"]):
        inp = x if i == 0 else outputs[-1]
        h = hidden_states[i]
        pre = [h @ layer["wh"][g] + layer["bh"][g]
               + inp @ layer["wx"][g] + layer["bx"][g] for g in range(4)]
        f = jax.nn.sigmoid(pre[0]); ig = jax.nn.sigmoid(pre[1])
        o = jax.nn.sigmoid(pre[2]); g_ = jnp.tanh(pre[3])
        c_new = f * cell_states[i] + ig * g_
        h_new = o * jnp.tanh(c_new)
        cstates.append(c_new); outputs.append(h_new)
    logits = outputs[-1] @ params["decoder"]["w"] + params["decoder"]["b"]
    logp = jax.nn.log_softmax(logits / 0.8, axis=-1)
    return logp, outputs, cstates


def reference_seq(params, x_seq, hidden_states, cell_states):
    h, c = list(hidden_states), list(cell_states)
    lps = []
    for t in range(x_seq.shape[0]):
        lp, h, c = reference_step(params, x_seq[t], h, c)
        lps.append(lp)
    return jnp.stack(lps), h, c


# ------------------------------ main ---------------------------------------- #

if __name__ == "__main__":
    vocab_size, hidden_size, n_layers, dropout = 32, 32, 2, 0.0
    batch, seq_len = 2, 8
    # TODO(synk): nn.Dropout omitted (dropout=0.0 / eval semantics -> identity).

    key = jax.random.PRNGKey(0)
    kp, kx, kh, kc = jax.random.split(key, 4)

    params = init_params(kp, vocab_size, hidden_size, n_layers)
    packed = pack_params(params, vocab_size, hidden_size)

    x_seq = jax.random.normal(kx, (seq_len, batch, vocab_size), jnp.float32)
    hidden_states = [
        jax.random.normal(jax.random.fold_in(kh, i), (batch, hidden_size), jnp.float32)
        for i in range(n_layers)
    ]
    cell_states = [
        jax.random.normal(jax.random.fold_in(kc, i), (batch, hidden_size), jnp.float32)
        for i in range(n_layers)
    ]

    # --- single step: exact mirror of LSTMNet.forward(x, h, c) ----------------
    log_probs, outputs, cstates = lstm_net_forward(packed, x_seq[0],
                                                   hidden_states, cell_states)
    jax.block_until_ready((log_probs, outputs, cstates))
    assert log_probs.shape == (batch, vocab_size)
    assert all(o.shape == (batch, hidden_size) for o in outputs)
    assert all(c.shape == (batch, hidden_size) for c in cstates)

    ref_lp, ref_out, ref_c = reference_step(params, x_seq[0], hidden_states,
                                            cell_states)
    # bf16 matmul operands with f32 accumulation -> loose tolerance.
    assert float(jnp.max(jnp.abs(log_probs - ref_lp))) < 1e-1
    for a, b in zip(outputs, ref_out):
        assert float(jnp.max(jnp.abs(a - b))) < 1e-1
    for a, b in zip(cstates, ref_c):
        assert float(jnp.max(jnp.abs(a - b))) < 1e-1

    # --- full T-step sequence in ONE pallas_call (weights stay VMEM-resident) -
    lp_seq, h_fin, c_fin = lstm_net_forward_seq(packed, x_seq, hidden_states,
                                                cell_states)
    jax.block_until_ready((lp_seq, h_fin, c_fin))
    assert lp_seq.shape == (seq_len, batch, vocab_size)

    ref_lp_seq, ref_h_fin, ref_c_fin = reference_seq(params, x_seq,
                                                     hidden_states, cell_states)
    # Error compounds mildly over 8 recurrent bf16 steps.
    assert float(jnp.max(jnp.abs(lp_seq - ref_lp_seq))) < 2e-1
    for a, b in zip(h_fin, ref_h_fin):
        assert float(jnp.max(jnp.abs(a - b))) < 2e-1
    for a, b in zip(c_fin, ref_c_fin):
        assert float(jnp.max(jnp.abs(a - b))) < 2e-1

    print("KERNEL_OK")
</pallas_src>

<mosaic_0001>
module attributes {stable_mosaic.version = 11 : i64} {
  func.func @_lstm_net_kernel(%arg0: i32, %arg1: memref<1x8x128xbf16, #tpu.memory_space<vmem>>, %arg2: memref<8x128xf32, #tpu.memory_space<vmem>>, %arg3: memref<8x128xf32, #tpu.memory_space<vmem>>, %arg4: memref<8x128xf32, #tpu.memory_space<vmem>>, %arg5: memref<8x128xf32, #tpu.memory_space<vmem>>, %arg6: memref<128x512xbf16, #tpu.memory_space<vmem>>, %arg7: memref<128x512xbf16, #tpu.memory_space<vmem>>, %arg8: memref<1x512xf32, #tpu.memory_space<vmem>>, %arg9: memref<128x512xbf16, #tpu.memory_space<vmem>>, %arg10: memref<128x512xbf16, #tpu.memory_space<vmem>>, %arg11: memref<1x512xf32, #tpu.memory_space<vmem>>, %arg12: memref<128x128xbf16, #tpu.memory_space<vmem>>, %arg13: memref<1x128xf32, #tpu.memory_space<vmem>>, %arg14: memref<1x8x128xf32, #tpu.memory_space<vmem>>, %arg15: memref<8x128xf32, #tpu.memory_space<vmem>>, %arg16: memref<8x128xf32, #tpu.memory_space<vmem>>, %arg17: memref<8x128xf32, #tpu.memory_space<vmem>>, %arg18: memref<8x128xf32, #tpu.memory_space<vmem>>, %arg19: memref<2x8x128xbf16, #tpu.memory_space<vmem>>) attributes {dimension_semantics = [#tpu.dimension_semantics<arbitrary>], iteration_bounds = array<i64: 1>, scalar_prefetch = 0 : i64, scratch_operands = 1 : i64, tpu.core_type = #tpu.core_type<tc>, window_params = [{transform_indices = @transform_0, window_bounds = array<i64: 1, 8, 128>}, {pipeline_mode = #tpu.pipeline_mode<synchronous>, transform_indices = @transform_1, window_bounds = array<i64: 8, 128>}, {pipeline_mode = #tpu.pipeline_mode<synchronous>, transform_indices = @transform_2, window_bounds = array<i64: 8, 128>}, {pipeline_mode = #tpu.pipeline_mode<synchronous>, transform_indices = @transform_3, window_bounds = array<i64: 8, 128>}, {pipeline_mode = #tpu.pipeline_mode<synchronous>, transform_indices = @transform_4, window_bounds = array<i64: 8, 128>}, {pipeline_mode = #tpu.pipeline_mode<synchronous>, transform_indices = @transform_5, window_bounds = array<i64: 128, 512>}, {pipeline_mode = #tpu.pipeline_mode<synchronous>, transform_indices = @transform_6, window_bounds = array<i64: 128, 512>}, {pipeline_mode = #tpu.pipeline_mode<synchronous>, transform_indices = @transform_7, window_bounds = array<i64: 1, 512>}, {pipeline_mode = #tpu.pipeline_mode<synchronous>, transform_indices = @transform_8, window_bounds = array<i64: 128, 512>}, {pipeline_mode = #tpu.pipeline_mode<synchronous>, transform_indices = @transform_9, window_bounds = array<i64: 128, 512>}, {pipeline_mode = #tpu.pipeline_mode<synchronous>, transform_indices = @transform_10, window_bounds = array<i64: 1, 512>}, {pipeline_mode = #tpu.pipeline_mode<synchronous>, transform_indices = @transform_11, window_bounds = array<i64: 128, 128>}, {pipeline_mode = #tpu.pipeline_mode<synchronous>, transform_indices = @transform_12, window_bounds = array<i64: 1, 128>}, {transform_indices = @transform_13, window_bounds = array<i64: 1, 8, 128>}, {pipeline_mode = #tpu.pipeline_mode<synchronous>, transform_indices = @transform_14, window_bounds = array<i64: 8, 128>}, {pipeline_mode = #tpu.pipeline_mode<synchronous>, transform_indices = @transform_15, window_bounds = array<i64: 8, 128>}, {pipeline_mode = #tpu.pipeline_mode<synchronous>, transform_indices = @transform_16, window_bounds = array<i64: 8, 128>}, {pipeline_mode = #tpu.pipeline_mode<synchronous>, transform_indices = @transform_17, window_bounds = array<i64: 8, 128>}]} {
    %c0_i32 = arith.constant 0 : i32
    %0 = arith.cmpi eq, %arg0, %c0_i32 : i32
    %1 = arith.extui %0 : i1 to i32
    %c0_i32_0 = arith.constant 0 : i32
    %2 = arith.cmpi ne, %1, %c0_i32_0 : i32
    scf.if %2 {
      %c0_54 = arith.constant 0 : index
      %c0_55 = arith.constant 0 : index
      %91 = vector.load %arg2[%c0_54, %c0_55] : memref<8x128xf32, #tpu.memory_space<vmem>>, vector<8x128xf32>
      %92 = arith.truncf %91 : vector<8x128xf32> to vector<8x128xbf16>
      %c0_56 = arith.constant 0 : index
      %c0_57 = arith.constant 0 : index
      %c0_58 = arith.constant 0 : index
      %93 = vector.load %arg19[%c0_56, %c0_57, %c0_58] : memref<2x8x128xbf16, #tpu.memory_space<vmem>>, vector<1x8x128xbf16>
      %94 = vector.shape_cast %93 : vector<1x8x128xbf16> to vector<8x128xbf16>
      %95 = vector.shape_cast %92 : vector<8x128xbf16> to vector<1x8x128xbf16>
      tpu.vector_store %arg19[%c0_56, %c0_57, %c0_58], %95 {strides = array<i32>} : memref<2x8x128xbf16, #tpu.memory_space<vmem>>, vector<1x8x128xbf16>,
      %c0_59 = arith.constant 0 : index
      %c0_60 = arith.constant 0 : index
      %96 = vector.load %arg3[%c0_59, %c0_60] : memref<8x128xf32, #tpu.memory_space<vmem>>, vector<8x128xf32>
      %c0_61 = arith.constant 0 : index
      %c0_62 = arith.constant 0 : index
      %97 = vector.load %arg16[%c0_61, %c0_62] : memref<8x128xf32, #tpu.memory_space<vmem>>, vector<8x128xf32>
      tpu.vector_store %arg16[%c0_61, %c0_62], %96 {strides = array<i32>} : memref<8x128xf32, #tpu.memory_space<vmem>>, vector<8x128xf32>,
      %c0_63 = arith.constant 0 : index
      %c0_64 = arith.constant 0 : index
      %98 = vector.load %arg4[%c0_63, %c0_64] : memref<8x128xf32, #tpu.memory_space<vmem>>, vector<8x128xf32>
      %99 = arith.truncf %98 : vector<8x128xf32> to vector<8x128xbf16>
      %c1_65 = arith.constant 1 : index
      %c0_66 = arith.constant 0 : index
      %c0_67 = arith.constant 0 : index
      %100 = vector.load %arg19[%c1_65, %c0_66, %c0_67] : memref<2x8x128xbf16, #tpu.memory_space<vmem>>, vector<1x8x128xbf16>
      %101 = vector.shape_cast %100 : vector<1x8x128xbf16> to vector<8x128xbf16>
      %102 = vector.shape_cast %99 : vector<8x128xbf16> to vector<1x8x128xbf16>
      tpu.vector_store %arg19[%c1_65, %c0_66, %c0_67], %102 {strides = array<i32>} : memref<2x8x128xbf16, #tpu.memory_space<vmem>>, vector<1x8x128xbf16>,
      %c0_68 = arith.constant 0 : index
      %c0_69 = arith.constant 0 : index
      %103 = vector.load %arg5[%c0_68, %c0_69] : memref<8x128xf32, #tpu.memory_space<vmem>>, vector<8x128xf32>
      %c0_70 = arith.constant 0 : index
      %c0_71 = arith.constant 0 : index
      %104 = vector.load %arg18[%c0_70, %c0_71] : memref<8x128xf32, #tpu.memory_space<vmem>>, vector<8x128xf32>
      tpu.vector_store %arg18[%c0_70, %c0_71], %103 {strides = array<i32>} : memref<8x128xf32, #tpu.memory_space<vmem>>, vector<8x128xf32>,
    } else {
    }
    %c0 = arith.constant 0 : index
    %c0_1 = arith.constant 0 : index
    %c0_2 = arith.constant 0 : index
    %3 = vector.load %arg1[%c0, %c0_1, %c0_2] : memref<1x8x128xbf16, #tpu.memory_space<vmem>>, vector<1x8x128xbf16>
    %4 = vector.shape_cast %3 : vector<1x8x128xbf16> to vector<8x128xbf16>
    %c0_3 = arith.constant 0 : index
    %c0_4 = arith.constant 0 : index
    %c0_5 = arith.constant 0 : index
    %5 = vector.load %arg19[%c0_3, %c0_4, %c0_5] : memref<2x8x128xbf16, #tpu.memory_space<vmem>>, vector<1x8x128xbf16>
    %6 = vector.shape_cast %5 : vector<1x8x128xbf16> to vector<8x128xbf16>
    %c0_6 = arith.constant 0 : index
    %c0_7 = arith.constant 0 : index
    %7 = vector.load %arg6[%c0_6, %c0_7] : memref<128x512xbf16, #tpu.memory_space<vmem>>, vector<128x512xbf16>
    %cst = arith.constant dense<0.000000e+00> : vector<8x512xf32>
    %8 = tpu.matmul %6, %7, %cst {dimension_numbers = #tpu.dot_dimension_numbers<[1], [0], [0], [1], [0, 0, 1, 1], [], []>} : vector<8x128xbf16>, vector<128x512xbf16>, vector<8x512xf32> -> vector<8x512xf32>
    %c0_8 = arith.constant 0 : index
    %c0_9 = arith.constant 0 : index
    %9 = vector.load %arg7[%c0_8, %c0_9] : memref<128x512xbf16, #tpu.memory_space<vmem>>, vector<128x512xbf16>
    %cst_10 = arith.constant dense<0.000000e+00> : vector<8x512xf32>
    %10 = tpu.matmul %4, %9, %cst_10 {dimension_numbers = #tpu.dot_dimension_numbers<[1], [0], [0], [1], [0, 0, 1, 1], [], []>} : vector<8x128xbf16>, vector<128x512xbf16>, vector<8x512xf32> -> vector<8x512xf32>
    %11 = arith.addf %8, %10 : vector<8x512xf32>
    %c0_11 = arith.constant 0 : index
    %c0_12 = arith.constant 0 : index
    %12 = vector.load %arg8[%c0_11, %c0_12] : memref<1x512xf32, #tpu.memory_space<vmem>>, vector<1x512xf32>
    %13 = vector.broadcast %12 : vector<1x512xf32> to vector<8x512xf32>
    %14 = arith.addf %11, %13 : vector<8x512xf32>
    %15 = vector.extract_strided_slice %14 {offsets = [0, 0], sizes = [8, 384], strides = [1, 1]} : vector<8x512xf32> to vector<8x384xf32>
    %16 = arith.negf %15 : vector<8x384xf32>
    %17 = math.exp %16 : vector<8x384xf32>
    %cst_13 = arith.constant 1.000000e+00 : f32
    %18 = vector.broadcast %cst_13 : f32 to vector<8x384xf32>
    %19 = arith.addf %18, %17 : vector<8x384xf32>
    %20 = arith.divf %18, %19 : vector<8x384xf32>
    %21 = vector.extract_strided_slice %20 {offsets = [0, 0], sizes = [8, 128], strides = [1, 1]} : vector<8x384xf32> to vector<8x128xf32>
    %22 = vector.extract_strided_slice %20 {offsets = [0, 128], sizes = [8, 128], strides = [1, 1]} : vector<8x384xf32> to vector<8x128xf32>
    %23 = vector.extract_strided_slice %20 {offsets = [0, 256], sizes = [8, 128], strides = [1, 1]} : vector<8x384xf32> to vector<8x128xf32>
    %24 = vector.extract_strided_slice %14 {offsets = [0, 384], sizes = [8, 128], strides = [1, 1]} : vector<8x512xf32> to vector<8x128xf32>
    %25 = math.tanh %24 : vector<8x128xf32>
    %c0_14 = arith.constant 0 : index
    %c0_15 = arith.constant 0 : index
    %26 = vector.load %arg16[%c0_14, %c0_15] : memref<8x128xf32, #tpu.memory_space<vmem>>, vector<8x128xf32>
    %27 = arith.mulf %21, %26 : vector<8x128xf32>
    %28 = arith.mulf %22, %25 : vector<8x128xf32>
    %29 = arith.addf %27, %28 : vector<8x128xf32>
    %30 = math.tanh %29 : vector<8x128xf32>
    %31 = arith.mulf %23, %30 : vector<8x128xf32>
    %c0_16 = arith.constant 0 : index
    %c0_17 = arith.constant 0 : index
    %32 = vector.load %arg16[%c0_16, %c0_17] : memref<8x128xf32, #tpu.memory_space<vmem>>, vector<8x128xf32>
    tpu.vector_store %arg16[%c0_16, %c0_17], %29 {strides = array<i32>} : memref<8x128xf32, #tpu.memory_space<vmem>>, vector<8x128xf32>,
    %c0_18 = arith.constant 0 : index
    %c0_19 = arith.constant 0 : index
    %33 = vector.load %arg15[%c0_18, %c0_19] : memref<8x128xf32, #tpu.memory_space<vmem>>, vector<8x128xf32>
    tpu.vector_store %arg15[%c0_18, %c0_19], %31 {strides = array<i32>} : memref<8x128xf32, #tpu.memory_space<vmem>>, vector<8x128xf32>,
    %34 = arith.truncf %31 : vector<8x128xf32> to vector<8x128xbf16>
    %c0_20 = arith.constant 0 : index
    %c0_21 = arith.constant 0 : index
    %c0_22 = arith.constant 0 : index
    %35 = vector.load %arg19[%c0_20, %c0_21, %c0_22] : memref<2x8x128xbf16, #tpu.memory_space<vmem>>, vector<1x8x128xbf16>
    %36 = vector.shape_cast %35 : vector<1x8x128xbf16> to vector<8x128xbf16>
    %37 = vector.shape_cast %34 : vector<8x128xbf16> to vector<1x8x128xbf16>
    tpu.vector_store %arg19[%c0_20, %c0_21, %c0_22], %37 {strides = array<i32>} : memref<2x8x128xbf16, #tpu.memory_space<vmem>>, vector<1x8x128xbf16>,
    %c1 = arith.constant 1 : index
    %c0_23 = arith.constant 0 : index
    %c0_24 = arith.constant 0 : index
    %38 = vector.load %arg19[%c1, %c0_23, %c0_24] : memref<2x8x128xbf16, #tpu.memory_space<vmem>>, vector<1x8x128xbf16>
    %39 = vector.shape_cast %38 : vector<1x8x128xbf16> to vector<8x128xbf16>
    %c0_25 = arith.constant 0 : index
    %c0_26 = arith.constant 0 : index
    %40 = vector.load %arg9[%c0_25, %c0_26] : memref<128x512xbf16, #tpu.memory_space<vmem>>, vector<128x512xbf16>
    %cst_27 = arith.constant dense<0.000000e+00> : vector<8x512xf32>
    %41 = tpu.matmul %39, %40, %cst_27 {dimension_numbers = #tpu.dot_dimension_numbers<[1], [0], [0], [1], [0, 0, 1, 1], [], []>} : vector<8x128xbf16>, vector<128x512xbf16>, vector<8x512xf32> -> vector<8x512xf32>
    %c0_28 = arith.constant 0 : index
    %c0_29 = arith.constant 0 : index
    %42 = vector.load %arg10[%c0_28, %c0_29] : memref<128x512xbf16, #tpu.memory_space<vmem>>, vector<128x512xbf16>
    %cst_30 = arith.constant dense<0.000000e+00> : vector<8x512xf32>
    %43 = tpu.matmul %34, %42, %cst_30 {dimension_numbers = #tpu.dot_dimension_numbers<[1], [0], [0], [1], [0, 0, 1, 1], [], []>} : vector<8x128xbf16>, vector<128x512xbf16>, vector<8x512xf32> -> vector<8x512xf32>
    %44 = arith.addf %41, %43 : vector<8x512xf32>
    %c0_31 = arith.constant 0 : index
    %c0_32 = arith.constant 0 : index
    %45 = vector.load %arg11[%c0_31, %c0_32] : memref<1x512xf32, #tpu.memory_space<vmem>>, vector<1x512xf32>
    %46 = vector.broadcast %45 : vector<1x512xf32> to vector<8x512xf32>
    %47 = arith.addf %44, %46 : vector<8x512xf32>
    %48 = vector.extract_strided_slice %47 {offsets = [0, 0], sizes = [8, 384], strides = [1, 1]} : vector<8x512xf32> to vector<8x384xf32>
    %49 = arith.negf %48 : vector<8x384xf32>
    %50 = math.exp %49 : vector<8x384xf32>
    %cst_33 = arith.constant 1.000000e+00 : f32
    %51 = vector.broadcast %cst_33 : f32 to vector<8x384xf32>
    %52 = arith.addf %51, %50 : vector<8x384xf32>
    %53 = arith.divf %51, %52 : vector<8x384xf32>
    %54 = vector.extract_strided_slice %53 {offsets = [0, 0], sizes = [8, 128], strides = [1, 1]} : vector<8x384xf32> to vector<8x128xf32>
    %55 = vector.extract_strided_slice %53 {offsets = [0, 128], sizes = [8, 128], strides = [1, 1]} : vector<8x384xf32> to vector<8x128xf32>
    %56 = vector.extract_strided_slice %53 {offsets = [0, 256], sizes = [8, 128], strides = [1, 1]} : vector<8x384xf32> to vector<8x128xf32>
    %57 = vector.extract_strided_slice %47 {offsets = [0, 384], sizes = [8, 128], strides = [1, 1]} : vector<8x512xf32> to vector<8x128xf32>
    %58 = math.tanh %57 : vector<8x128xf32>
    %c0_34 = arith.constant 0 : index
    %c0_35 = arith.constant 0 : index
    %59 = vector.load %arg18[%c0_34, %c0_35] : memref<8x128xf32, #tpu.memory_space<vmem>>, vector<8x128xf32>
    %60 = arith.mulf %54, %59 : vector<8x128xf32>
    %61 = arith.mulf %55, %58 : vector<8x128xf32>
    %62 = arith.addf %60, %61 : vector<8x128xf32>
    %63 = math.tanh %62 : vector<8x128xf32>
    %64 = arith.mulf %56, %63 : vector<8x128xf32>
    %c0_36 = arith.constant 0 : index
    %c0_37 = arith.constant 0 : index
    %65 = vector.load %arg18[%c0_36, %c0_37] : memref<8x128xf32, #tpu.memory_space<vmem>>, vector<8x128xf32>
    tpu.vector_store %arg18[%c0_36, %c0_37], %62 {strides = array<i32>} : memref<8x128xf32, #tpu.memory_space<vmem>>, vector<8x128xf32>,
    %c0_38 = arith.constant 0 : index
    %c0_39 = arith.constant 0 : index
    %66 = vector.load %arg17[%c0_38, %c0_39] : memref<8x128xf32, #tpu.memory_space<vmem>>, vector<8x128xf32>
    tpu.vector_store %arg17[%c0_38, %c0_39], %64 {strides = array<i32>} : memref<8x128xf32, #tpu.memory_space<vmem>>, vector<8x128xf32>,
    %67 = arith.truncf %64 : vector<8x128xf32> to vector<8x128xbf16>
    %c1_40 = arith.constant 1 : index
    %c0_41 = arith.constant 0 : index
    %c0_42 = arith.constant 0 : index
    %68 = vector.load %arg19[%c1_40, %c0_41, %c0_42] : memref<2x8x128xbf16, #tpu.memory_space<vmem>>, vector<1x8x128xbf16>
    %69 = vector.shape_cast %68 : vector<1x8x128xbf16> to vector<8x128xbf16>
    %70 = vector.shape_cast %67 : vector<8x128xbf16> to vector<1x8x128xbf16>
    tpu.vector_store %arg19[%c1_40, %c0_41, %c0_42], %70 {strides = array<i32>} : memref<2x8x128xbf16, #tpu.memory_space<vmem>>, vector<1x8x128xbf16>,
    %c0_43 = arith.constant 0 : index
    %c0_44 = arith.constant 0 : index
    %71 = vector.load %arg12[%c0_43, %c0_44] : memref<128x128xbf16, #tpu.memory_space<vmem>>, vector<128x128xbf16>
    %cst_45 = arith.constant dense<0.000000e+00> : vector<8x128xf32>
    %72 = tpu.matmul %67, %71, %cst_45 {dimension_numbers = #tpu.dot_dimension_numbers<[1], [0], [0], [1], [0, 0, 1, 1], [], []>} : vector<8x128xbf16>, vector<128x128xbf16>, vector<8x128xf32> -> vector<8x128xf32>
    %c0_46 = arith.constant 0 : index
    %c0_47 = arith.constant 0 : index
    %73 = vector.load %arg13[%c0_46, %c0_47] : memref<1x128xf32, #tpu.memory_space<vmem>>, vector<1x128xf32>
    %74 = vector.broadcast %73 : vector<1x128xf32> to vector<8x128xf32>
    %75 = arith.addf %72, %74 : vector<8x128xf32>
    %cst_48 = arith.constant 1.250000e+00 : f32
    %76 = vector.broadcast %cst_48 : f32 to vector<8x128xf32>
    %77 = arith.mulf %75, %76 : vector<8x128xf32>
    %cst_49 = arith.constant dense<0xFF800000> : vector<8xf32>
    %78 = vector.multi_reduction <maximumf>, %77, %cst_49 [1] : vector<8x128xf32> to vector<8xf32>
    %79 = vector.shape_cast %78 : vector<8xf32> to vector<8x1xf32>
    %80 = vector.broadcast %79 : vector<8x1xf32> to vector<8x128xf32>
    %81 = arith.subf %77, %80 : vector<8x128xf32>
    %82 = math.exp %81 : vector<8x128xf32>
    %cst_50 = arith.constant dense<0.000000e+00> : vector<8xf32>
    %83 = vector.multi_reduction <add>, %82, %cst_50 [1] : vector<8x128xf32> to vector<8xf32>
    %84 = vector.shape_cast %83 : vector<8xf32> to vector<8x1xf32>
    %85 = math.log %84 : vector<8x1xf32>
    %86 = vector.broadcast %85 : vector<8x1xf32> to vector<8x128xf32>
    %87 = arith.subf %81, %86 : vector<8x128xf32>
    %c0_51 = arith.constant 0 : index
    %c0_52 = arith.constant 0 : index
    %c0_53 = arith.constant 0 : index
    %88 = vector.load %arg14[%c0_51, %c0_52, %c0_53] : memref<1x8x128xf32, #tpu.memory_space<vmem>>, vector<1x8x128xf32>
    %89 = vector.shape_cast %88 : vector<1x8x128xf32> to vector<8x128xf32>
    %90 = vector.shape_cast %87 : vector<8x128xf32> to vector<1x8x128xf32>
    tpu.vector_store %arg14[%c0_51, %c0_52, %c0_53], %90 {strides = array<i32>} : memref<1x8x128xf32, #tpu.memory_space<vmem>>, vector<1x8x128xf32>,
    return
  }
  func.func @transform_0(%arg0: i32) -> (i32, i32, i32) {
    %c0_i32 = arith.constant 0 : i32
    %c0_i32_0 = arith.constant 0 : i32
    %c0_i32_1 = arith.constant 0 : i32
    return %arg0, %c0_i32, %c0_i32_0 : i32, i32, i32
  }
  func.func @transform_1(%arg0: i32) -> (i32, i32) {
    %c0_i32 = arith.constant 0 : i32
    %c0_i32_0 = arith.constant 0 : i32
    %c0_i32_1 = arith.constant 0 : i32
    return %c0_i32, %c0_i32_0 : i32, i32
  }
  func.func @transform_2(%arg0: i32) -> (i32, i32) {
    %c0_i32 = arith.constant 0 : i32
    %c0_i32_0 = arith.constant 0 : i32
    %c0_i32_1 = arith.constant 0 : i32
    return %c0_i32, %c0_i32_0 : i32, i32
  }
  func.func @transform_3(%arg0: i32) -> (i32, i32) {
    %c0_i32 = arith.constant 0 : i32
    %c0_i32_0 = arith.constant 0 : i32
    %c0_i32_1 = arith.constant 0 : i32
    return %c0_i32, %c0_i32_0 : i32, i32
  }
  func.func @transform_4(%arg0: i32) -> (i32, i32) {
    %c0_i32 = arith.constant 0 : i32
    %c0_i32_0 = arith.constant 0 : i32
    %c0_i32_1 = arith.constant 0 : i32
    return %c0_i32, %c0_i32_0 : i32, i32
  }
  func.func @transform_5(%arg0: i32) -> (i32, i32) {
    %c0_i32 = arith.constant 0 : i32
    %c0_i32_0 = arith.constant 0 : i32
    %c0_i32_1 = arith.constant 0 : i32
    return %c0_i32, %c0_i32_0 : i32, i32
  }
  func.func @transform_6(%arg0: i32) -> (i32, i32) {
    %c0_i32 = arith.constant 0 : i32
    %c0_i32_0 = arith.constant 0 : i32
    %c0_i32_1 = arith.constant 0 : i32
    return %c0_i32, %c0_i32_0 : i32, i32
  }
  func.func @transform_7(%arg0: i32) -> (i32, i32) {
    %c0_i32 = arith.constant 0 : i32
    %c0_i32_0 = arith.constant 0 : i32
    %c0_i32_1 = arith.constant 0 : i32
    return %c0_i32, %c0_i32_0 : i32, i32
  }
  func.func @transform_8(%arg0: i32) -> (i32, i32) {
    %c0_i32 = arith.constant 0 : i32
    %c0_i32_0 = arith.constant 0 : i32
    %c0_i32_1 = arith.constant 0 : i32
    return %c0_i32, %c0_i32_0 : i32, i32
  }
  func.func @transform_9(%arg0: i32) -> (i32, i32) {
    %c0_i32 = arith.constant 0 : i32
    %c0_i32_0 = arith.constant 0 : i32
    %c0_i32_1 = arith.constant 0 : i32
    return %c0_i32, %c0_i32_0 : i32, i32
  }
  func.func @transform_10(%arg0: i32) -> (i32, i32) {
    %c0_i32 = arith.constant 0 : i32
    %c0_i32_0 = arith.constant 0 : i32
    %c0_i32_1 = arith.constant 0 : i32
    return %c0_i32, %c0_i32_0 : i32, i32
  }
  func.func @transform_11(%arg0: i32) -> (i32, i32) {
    %c0_i32 = arith.constant 0 : i32
    %c0_i32_0 = arith.constant 0 : i32
    %c0_i32_1 = arith.constant 0 : i32
    return %c0_i32, %c0_i32_0 : i32, i32
  }
  func.func @transform_12(%arg0: i32) -> (i32, i32) {
    %c0_i32 = arith.constant 0 : i32
    %c0_i32_0 = arith.constant 0 : i32
    %c0_i32_1 = arith.constant 0 : i32
    return %c0_i32, %c0_i32_0 : i32, i32
  }
  func.func @transform_13(%arg0: i32) -> (i32, i32, i32) {
    %c0_i32 = arith.constant 0 : i32
    %c0_i32_0 = arith.constant 0 : i32
    %c0_i32_1 = arith.constant 0 : i32
    return %arg0, %c0_i32, %c0_i32_0 : i32, i32, i32
  }
  func.func @transform_14(%arg0: i32) -> (i32, i32) {
    %c0_i32 = arith.constant 0 : i32
    %c0_i32_0 = arith.constant 0 : i32
    %c0_i32_1 = arith.constant 0 : i32
    return %c0_i32, %c0_i32_0 : i32, i32
  }
  func.func @transform_15(%arg0: i32) -> (i32, i32) {
    %c0_i32 = arith.constant 0 : i32
    %c0_i32_0 = arith.constant 0 : i32
    %c0_i32_1 = arith.constant 0 : i32
    return %c0_i32, %c0_i32_0 : i32, i32
  }
  func.func @transform_16(%arg0: i32) -> (i32, i32) {
    %c0_i32 = arith.constant 0 : i32
    %c0_i32_0 = arith.constant 0 : i32
    %c0_i32_1 = arith.constant 0 : i32
    return %c0_i32, %c0_i32_0 : i32, i32
  }
  func.func @transform_17(%arg0: i32) -> (i32, i32) {
    %c0_i32 = arith.constant 0 : i32
    %c0_i32_0 = arith.constant 0 : i32
    %c0_i32_1 = arith.constant 0 : i32
    return %c0_i32, %c0_i32_0 : i32, i32
  }
}

</mosaic_0001>

<bundles_post_ra>
// kernel: tpu_custom_call.1
= control target key start
LH: loop header
LB: loop body
LE: loop exit
PB: predicated region body
PF: predicated region fallthrough
CT: control target
= control target key end

     0   :  { %s2692_s0 = inlined_call_operand.hbm [shape: bf16[1,8,128], index: 0, kind: input, shape index: {}]   ;;  %s2693_s1 = inlined_call_operand.hbm [shape: f32[8,128], index: 1, kind: input, shape index: {}]   ;;  %s2694_s2 = inlined_call_operand.hbm [shape: f32[8,128], index: 2, kind: input, shape index: {}]   ;;  %s2695_s3 = inlined_call_operand.vmem [shape: f32[8,128], index: 3, kind: input, shape index: {}]   ;;  %s2696_s4 = inlined_call_operand.hbm [shape: f32[8,128], index: 4, kind: input, shape index: {}]   ;;  %s2697_s5 = inlined_call_operand.hbm [shape: bf16[128,512], index: 5, kind: input, shape index: {}]   ;;  %s2698_s6 = inlined_call_operand.hbm [shape: bf16[128,512], index: 6, kind: input, shape index: {}]   ;;  %s2699_s7 = inlined_call_operand.vmem [shape: f32[1,512], index: 7, kind: input, shape index: {}]   ;;  %s2700_s8 = inlined_call_operand.hbm [shape: bf16[128,512], index: 8, kind: input, shape index: {}]   ;;  %s2701_s9 = inlined_call_operand.hbm [shape: bf16[128,512], index: 9, kind: input, shape index: {}]   ;;  %s2702_s10 = inlined_call_operand.vmem [shape: f32[1,512], index: 10, kind: input, shape index: {}]   ;;  %s2703_s11 = inlined_call_operand.hbm [shape: bf16[128,128], index: 11, kind: input, shape index: {}]   ;;  %s2704_s12 = inlined_call_operand.vmem [shape: f32[1,128], index: 12, kind: input, shape index: {}]   ;;  %s2705_s13 = inlined_call_operand.hbm [shape: f32[1,8,128], index: 13, kind: output, shape index: {0}]   ;;  %s2706_s14 = inlined_call_operand.hbm [shape: f32[8,128], index: 14, kind: output, shape index: {1}]   ;;  %s2707_s15 = inlined_call_operand.hbm [shape: f32[8,128], index: 15, kind: output, shape index: {2}]   ;;  %s2708_s16 = inlined_call_operand.hbm [shape: f32[8,128], index: 16, kind: output, shape index: {3}]   ;;  %s2709_s17 = inlined_call_operand.hbm [shape: f32[8,128], index: 17, kind: output, shape index: {4}]  }
   0x1   :  { %2712 = sst [smem:[#allocation33_spill]] %s2692_s0 }
   0x2   :  { %2713 = sst [smem:[#allocation34_spill]] %s2693_s1 }
   0x3   :  { %23 = vsyncpa [#allocation4], 0 }
   0x4   :  { %24 = vsyncpa [#allocation7], 0 }
   0x5   :  { %25 = vsyncpa [#allocation10], 0 }
   0x6   :  { %26 = vsyncpa [#allocation13], 0 }
   0x7   :  { %27 = vsyncpa [#allocation16], 0 }
   0x8   :  { %28 = vsyncpa [#allocation5], 0 }
   0x9   :  { %29 = vsyncpa [#allocation20], 0 }
   0xa   :  { %30 = vsyncpa [#allocation23], 0  ;;  %s2341_s24 = smov [#allocation6]   ;;  %s2342_s26 = smov [#allocation9]  }
   0xb   :  { %s47_s25 = sshll.u32 %s2341_s24, 4  ;;  %s69_s27 = sshll.u32 %s2342_s26, 4  ;;  %s48_s25 = int_to_ptr.vmem [resolvable:$true] %s47_s25  ;;  %s70_s27 = int_to_ptr.vmem [resolvable:$true] %s69_s27 }
   0xc   :  { %s2714_s0 = sld [smem:[#allocation34_spill]] }
  0x12   :  { %s2017_s30 = scalar_lea.hbm %s2714_s0, 128 }
  0x13   :  { %p2018_p0 = scmp.ne.s32.totalorder %s2714_s0, %s2017_s30  ;;  %p2021_p1 = scmp.lt.u32.totalorder %s2017_s30, %s2714_s0 }
  0x15   :  { %p2023_p2 = pnand %p2021_p1, %p2018_p0 }
  0x17   :  { %2026 = shalt.err (!%p2023_p2)
}
  0x18   :  { %s2027_s21 = scalar_lea.vmem %s48_s25, 128  ;;  %p2032_p4 = scmp.lt.s32.totalorder %s48_s25, %s48_s25 }
  0x19   :  { %p2028_p3 = scmp.ne.s32.totalorder %s48_s25, %s2027_s21  ;;  %p2033_p5 = scmp.lt.s32.totalorder %s2027_s21, %s2027_s21 }
  0x1b   :  { %p2034_p6 = por %p2033_p5, %p2032_p4 }
  0x1d   :  { %p2035_p7 = pnand %p2034_p6, %p2028_p3 }
  0x1f   :  { %2038 = shalt.err (!%p2035_p7)
}
  0x20   :  { %50 = dma.hbm_to_vmem [thread:$0]  %s2714_s0, 128, %s48_s25, [#allocation7]  }
  0x21   :  { %s2039_s28 = scalar_lea.hbm %s2696_s4, 128 }
  0x22   :  { %p2040_p8 = scmp.ne.s32.totalorder %s2696_s4, %s2039_s28  ;;  %p2043_p9 = scmp.lt.u32.totalorder %s2039_s28, %s2696_s4 }
  0x24   :  { %p2045_p10 = pnand %p2043_p9, %p2040_p8 }
  0x26   :  { %2048 = shalt.err (!%p2045_p10)
}
  0x27   :  { %s2049_s1 = scalar_lea.vmem %s70_s27, 128  ;;  %p2054_p12 = scmp.lt.s32.totalorder %s70_s27, %s70_s27 }
  0x28   :  { %p2050_p11 = scmp.ne.s32.totalorder %s70_s27, %s2049_s1  ;;  %p2055_p13 = scmp.lt.s32.totalorder %s2049_s1, %s2049_s1 }
  0x2a   :  { %p2056_p0 = por %p2055_p13, %p2054_p12 }
  0x2c   :  { %p2057_p1 = pnand %p2056_p0, %p2050_p11 }
  0x2e   :  { %2060 = shalt.err (!%p2057_p1)
}
  0x2f   :  { %72 = dma.hbm_to_vmem [thread:$0]  %s2696_s4, 128, %s70_s27, [#allocation10]  }
  0x30   :  { %s2343_s20 = smov [#allocation12]   ;;  %s2344_s22 = smov [#allocation15]  }
  0x31   :  { %s90_s21 = sshll.u32 %s2343_s20, 4  ;;  %s116_s23 = sshll.u32 %s2344_s22, 4  ;;  %s91_s21 = int_to_ptr.vmem [resolvable:$true] %s90_s21  ;;  %s2476_s23 = int_to_ptr.vmem [resolvable:$true] %s116_s23 }
  0x32   :  { %s2061_s28 = scalar_lea.hbm %s2698_s6, 4096 }
  0x33   :  { %p2062_p2 = scmp.ne.s32.totalorder %s2698_s6, %s2061_s28  ;;  %p2065_p3 = scmp.lt.u32.totalorder %s2061_s28, %s2698_s6 }
  0x35   :  { %p2067_p4 = pnand %p2065_p3, %p2062_p2 }
  0x37   :  { %2070 = shalt.err (!%p2067_p4)
}
  0x38   :  { %s2071_s4 = scalar_lea.vmem %s91_s21, 4096  ;;  %p2076_p6 = scmp.lt.s32.totalorder %s91_s21, %s91_s21 }
  0x39   :  { %p2072_p5 = scmp.ne.s32.totalorder %s91_s21, %s2071_s4  ;;  %p2077_p7 = scmp.lt.s32.totalorder %s2071_s4, %s2071_s4 }
  0x3b   :  { %p2078_p8 = por %p2077_p7, %p2076_p6 }
  0x3d   :  { %p2079_p9 = pnand %p2078_p8, %p2072_p5 }
  0x3f   :  { %2082 = shalt.err (!%p2079_p9)
}
  0x40   :  { %s2345_s27 = smov 256   ;;  %s2346_s1 = smov 16  }
  0x41   :  { %96 = dma.hbm_to_vmem [thread:$0]  %s2698_s6, 4096, %s91_s21, [#allocation13], %s2345_s27, %s2345_s27, %s2346_s1  }
  0x42   :  { %s2083_s24 = scalar_lea.hbm %s2701_s9, 4096 }
  0x43   :  { %p2084_p10 = scmp.ne.s32.totalorder %s2701_s9, %s2083_s24  ;;  %p2087_p11 = scmp.lt.u32.totalorder %s2083_s24, %s2701_s9 }
  0x45   :  { %p2089_p12 = pnand %p2087_p11, %p2084_p10 }
  0x47   :  { %2092 = shalt.err (!%p2089_p12)
}
  0x48   :  { %s2093_s30 = scalar_lea.vmem %s2476_s23, 4096  ;;  %p2098_p0 = scmp.lt.s32.totalorder %s2476_s23, %s2476_s23 }
  0x49   :  { %p2094_p13 = scmp.ne.s32.totalorder %s2476_s23, %s2093_s30  ;;  %p2099_p1 = scmp.lt.s32.totalorder %s2093_s30, %s2093_s30 }
  0x4b   :  { %p2100_p2 = por %p2099_p1, %p2098_p0 }
  0x4d   :  { %p2101_p3 = pnand %p2100_p2, %p2094_p13 }
  0x4f   :  { %2104 = shalt.err (!%p2101_p3)
}
  0x50   :  { %122 = dma.hbm_to_vmem [thread:$0]  %s2701_s9, 4096, %s2476_s23, [#allocation16], %s2345_s27, %s2345_s27, %s2346_s1  }
  0x51   :  { %s2347_s19 = smov [#allocation3]   ;;  %s2348_s25 = smov [#allocation8]  }
  0x52   :  { %s37_s4 = sshll.u32 %s2347_s19, 4  ;;  %s57_s0 = sshll.u32 %s2348_s25, 4  ;;  %s38_s4 = int_to_ptr.vmem [resolvable:$true] %s37_s4  ;;  %s58_s0 = int_to_ptr.vmem [resolvable:$true] %s57_s0 }
  0x53   :  { %s2715_s24 = sld [smem:[#allocation33_spill]] }
  0x59   :  { %s2105_s26 = scalar_lea.hbm %s2715_s24, 64 }
  0x5a   :  { %p2106_p4 = scmp.ne.s32.totalorder %s2715_s24, %s2105_s26  ;;  %p2109_p5 = scmp.lt.u32.totalorder %s2105_s26, %s2715_s24 }
  0x5c   :  { %p2111_p6 = pnand %p2109_p5, %p2106_p4 }
  0x5e   :  { %2114 = shalt.err (!%p2111_p6)
}
  0x5f   :  { %s2115_s9 = scalar_lea.vmem %s38_s4, 64  ;;  %p2120_p8 = scmp.lt.s32.totalorder %s38_s4, %s38_s4 }
  0x60   :  { %p2116_p7 = scmp.ne.s32.totalorder %s38_s4, %s2115_s9  ;;  %p2121_p9 = scmp.lt.s32.totalorder %s2115_s9, %s2115_s9 }
  0x62   :  { %p2122_p10 = por %p2121_p9, %p2120_p8 }
  0x64   :  { %p2123_p11 = pnand %p2122_p10, %p2116_p7 }
  0x66   :  { %2126 = shalt.err (!%p2123_p11)
}
  0x67   :  { %40 = dma.hbm_to_vmem [thread:$0]  %s2715_s24, 64, %s38_s4, [#allocation4]  }
  0x68   :  { %s2127_s25 = scalar_lea.hbm %s2694_s2, 128 }
  0x69   :  { %p2128_p12 = scmp.ne.s32.totalorder %s2694_s2, %s2127_s25  ;;  %p2131_p13 = scmp.lt.u32.totalorder %s2127_s25, %s2694_s2 }
  0x6b   :  { %p2133_p0 = pnand %p2131_p13, %p2128_p12 }
  0x6d   :  { %2136 = shalt.err (!%p2133_p0)
}
  0x6e   :  { %s2137_s29 = scalar_lea.vmem %s58_s0, 128  ;;  %p2142_p2 = scmp.lt.s32.totalorder %s58_s0, %s58_s0 }
  0x6f   :  { %p2138_p1 = scmp.ne.s32.totalorder %s58_s0, %s2137_s29  ;;  %p2143_p3 = scmp.lt.s32.totalorder %s2137_s29, %s2137_s29 }
  0x71   :  { %p2144_p4 = por %p2143_p3, %p2142_p2 }
  0x73   :  { %p2145_p5 = pnand %p2144_p4, %p2138_p1 }
  0x75   :  { %2148 = shalt.err (!%p2145_p5)
}
  0x76   :  { %60 = dma.hbm_to_vmem [thread:$0]  %s2694_s2, 128, %s58_s0, [#allocation7]  }
  0x77   :  { %s2349_s18 = smov [#allocation11]   ;;  %s2350_s9 = smov [#allocation14]  }
  0x78   :  { %s78_s30 = sshll.u32 %s2349_s18, 4  ;;  %s104_s23 = sshll.u32 %s2350_s9, 4  ;;  %s79_s30 = int_to_ptr.vmem [resolvable:$true] %s78_s30  ;;  %s2537_s23 = int_to_ptr.vmem [resolvable:$true] %s104_s23 }
  0x79   :  { %s2149_s19 = scalar_lea.hbm %s2697_s5, 4096 }
  0x7a   :  { %p2150_p6 = scmp.ne.s32.totalorder %s2697_s5, %s2149_s19  ;;  %p2153_p7 = scmp.lt.u32.totalorder %s2149_s19, %s2697_s5 }
  0x7c   :  { %p2155_p8 = pnand %p2153_p7, %p2150_p6 }
  0x7e   :  { %2158 = shalt.err (!%p2155_p8)
}
  0x7f   :  { %s2159_s2 = scalar_lea.vmem %s79_s30, 4096  ;;  %p2164_p10 = scmp.lt.s32.totalorder %s79_s30, %s79_s30 }
  0x80   :  { %p2160_p9 = scmp.ne.s32.totalorder %s79_s30, %s2159_s2  ;;  %p2165_p11 = scmp.lt.s32.totalorder %s2159_s2, %s2159_s2 }
  0x82   :  { %p2166_p12 = por %p2165_p11, %p2164_p10 }
  0x84   :  { %p2167_p13 = pnand %p2166_p12, %p2160_p9 }
  0x86   :  { %2170 = shalt.err (!%p2167_p13)
}
  0x87   :  { %84 = dma.hbm_to_vmem [thread:$0]  %s2697_s5, 4096, %s79_s30, [#allocation10], %s2345_s27, %s2345_s27, %s2346_s1  }
  0x88   :  { %s2171_s24 = scalar_lea.hbm %s2700_s8, 4096 }
  0x89   :  { %p2172_p0 = scmp.ne.s32.totalorder %s2700_s8, %s2171_s24  ;;  %p2175_p1 = scmp.lt.u32.totalorder %s2171_s24, %s2700_s8 }
  0x8b   :  { %p2177_p2 = pnand %p2175_p1, %p2172_p0 }
  0x8d   :  { %2180 = shalt.err (!%p2177_p2)
}
  0x8e   :  { %s2181_s19 = scalar_lea.vmem %s2537_s23, 4096  ;;  %p2186_p4 = scmp.lt.s32.totalorder %s2537_s23, %s2537_s23 }
  0x8f   :  { %p2182_p3 = scmp.ne.s32.totalorder %s2537_s23, %s2181_s19  ;;  %p2187_p5 = scmp.lt.s32.totalorder %s2181_s19, %s2181_s19 }
  0x91   :  { %p2188_p6 = por %p2187_p5, %p2186_p4 }
  0x93   :  { %p2189_p7 = pnand %p2188_p6, %p2182_p3 }
  0x95   :  { %2192 = shalt.err (!%p2189_p7)
}
  0x96   :  { %110 = dma.hbm_to_vmem [thread:$0]  %s2700_s8, 4096, %s2537_s23, [#allocation13], %s2345_s27, %s2345_s27, %s2346_s1  }
  0x97   :  { %s2351_s25 = smov [#allocation17]   ;;  %s2193_s2 = scalar_lea.hbm %s2703_s11, 1024 }
  0x98   :  { %s130_s20 = sshll.u32 %s2351_s25, 4  ;;  %p2194_p8 = scmp.ne.s32.totalorder %s2703_s11, %s2193_s2  ;;  %s131_s20 = int_to_ptr.vmem [resolvable:$true] %s130_s20 }
  0x99   :  { %p2197_p9 = scmp.lt.u32.totalorder %s2193_s2, %s2703_s11 }
  0x9b   :  { %p2199_p10 = pnand %p2197_p9, %p2194_p8 }
  0x9d   :  { %2202 = shalt.err (!%p2199_p10)
}
  0x9e   :  { %s2203_s24 = scalar_lea.vmem %s131_s20, 1024  ;;  %p2208_p12 = scmp.lt.s32.totalorder %s131_s20, %s131_s20 }
  0x9f   :  { %p2204_p11 = scmp.ne.s32.totalorder %s131_s20, %s2203_s24  ;;  %p2209_p13 = scmp.lt.s32.totalorder %s2203_s24, %s2203_s24 }
  0xa1   :  { %p2210_p0 = por %p2209_p13, %p2208_p12 }
  0xa3   :  { %p2211_p1 = pnand %p2210_p0, %p2204_p11 }
  0xa5   :  { %2214 = shalt.err (!%p2211_p1)
}
  0xa6   :  { %s2352_s8 = smov 64   ;;  %s2353_s27 = smov 4  }
  0xa7   :  { %136 = dma.hbm_to_vmem [thread:$0]  %s2703_s11, 1024, %s131_s20, [#allocation16], %s2352_s8, %s2352_s8, %s2353_s27  }
  0xa8   :  { %2325 = dma.done.wait [#allocation4], 64  }
  0xa9   :  { %2326 = vsyncadd [#allocation4], 4294967232 }
  0xaa   :  { %2327 = dma.done.wait [#allocation7], 256  }
  0xab   :  { %2328 = vsyncadd [#allocation7], 4294967040 }
  0xac   :  { %2329 = dma.done.wait [#allocation10], 4224  }
  0xad   :  { %2330 = vsyncadd [#allocation10], 4294963072 }
  0xae   :  { %2331 = dma.done.wait [#allocation13], 8192  }
  0xaf   :  { %2332 = vsyncadd [#allocation13], 4294959104 }
  0xb0   :  { %2333 = dma.done.wait [#allocation16], 5120  }
  0xb1   :  { %2334 = vsyncadd [#allocation16], 4294962176  ;;  %v2354_v0 = vmov 0   ;;  %v1781_v1 = vld [vmem:[#allocation12 + $0x4] ss:$16 sps:$4 sm:$0xff]   ;;  %v171_v52 = vld [vmem:[#allocation6] sm:$0xff] }
  0xb2   :  { %440 = vmatprep.mubr.bf16.mxu0 %v2354_v0  ;;  %481 = vmatprep.mubr.bf16.mxu1 %v2354_v0  ;;  %v1783_v2 = vld [vmem:[#allocation12 + $0xc] ss:$16 sps:$4 sm:$0xff]   ;;  %v1785_v3 = vld [vmem:[#allocation12] ss:$16 sps:$4 sm:$0xff]   ;;  %v1786_v4 = vld [vmem:[#allocation12 + $0x8] ss:$16 sps:$4 sm:$0xff]   ;;  %v172_v53 = vpack.c.bf16 %v171_v52, %v171_v52 }
  0xb3   :  { %408 = vmatprep.subr.bf16.mxu0 %v1781_v1  ;;  %449 = vmatprep.subr.bf16.mxu1 %v1783_v2  ;;  %v1787_v5 = vld [vmem:[#allocation12 + $0x24] ss:$16 sps:$4 sm:$0xff]   ;;  %v1789_v6 = vld [vmem:[#allocation12 + $0x2c] ss:$16 sps:$4 sm:$0xff]   ;;  %v1791_v7 = vld [vmem:[#allocation12 + $0x20] ss:$16 sps:$4 sm:$0xff]  }
  0xb4   :  { %409 = vmatpush1.bf16.msra.mxu0 %v1785_v3  ;;  %450 = vmatpush1.bf16.msra.mxu1 %v1786_v4  ;;  %v1792_v8 = vld [vmem:[#allocation12 + $0x28] ss:$16 sps:$4 sm:$0xff]   ;;  %v1793_v9 = vld [vmem:[#allocation12 + $0x44] ss:$16 sps:$4 sm:$0xff]   ;;  %v1795_v10 = vld [vmem:[#allocation12 + $0x4c] ss:$16 sps:$4 sm:$0xff]  }
  0xb5   :  { %410 = vmatprep.subr.bf16.mxu0 %v1787_v5  ;;  %451 = vmatprep.subr.bf16.mxu1 %v1789_v6  ;;  %v1797_v11 = vld [vmem:[#allocation12 + $0x40] ss:$16 sps:$4 sm:$0xff]   ;;  %v1798_v12 = vld [vmem:[#allocation12 + $0x48] ss:$16 sps:$4 sm:$0xff]   ;;  %v1799_v13 = vld [vmem:[#allocation12 + $0x64] ss:$16 sps:$4 sm:$0xff]  }
  0xb6   :  { %v1801_v14 = vld [vmem:[#allocation12 + $0x6c] ss:$16 sps:$4 sm:$0xff]   ;;  %v1803_v15 = vld [vmem:[#allocation12 + $0x60] ss:$16 sps:$4 sm:$0xff]   ;;  %v1804_v16 = vld [vmem:[#allocation12 + $0x68] ss:$16 sps:$4 sm:$0xff]  }
  0xb7   :  { %v1805_v17 = vld [vmem:[#allocation12 + $0x84] ss:$16 sps:$4 sm:$0xff]   ;;  %v1807_v18 = vld [vmem:[#allocation12 + $0x8c] ss:$16 sps:$4 sm:$0xff]   ;;  %v1809_v19 = vld [vmem:[#allocation12 + $0x80] ss:$16 sps:$4 sm:$0xff]  }
  0xb8   :  { %411 = vmatpush1.bf16.msra.mxu0 %v1791_v7  ;;  %452 = vmatpush1.bf16.msra.mxu1 %v1792_v8  ;;  %v1810_v20 = vld [vmem:[#allocation12 + $0x88] ss:$16 sps:$4 sm:$0xff]   ;;  %v1811_v21 = vld [vmem:[#allocation12 + $0xa4] ss:$16 sps:$4 sm:$0xff]   ;;  %v1813_v22 = vld [vmem:[#allocation12 + $0xac] ss:$16 sps:$4 sm:$0xff]  }
  0xb9   :  { %412 = vmatprep.subr.bf16.mxu0 %v1793_v9  ;;  %453 = vmatprep.subr.bf16.mxu1 %v1795_v10  ;;  %v1815_v23 = vld [vmem:[#allocation12 + $0xa0] ss:$16 sps:$4 sm:$0xff]   ;;  %v1816_v24 = vld [vmem:[#allocation12 + $0xa8] ss:$16 sps:$4 sm:$0xff]   ;;  %v1817_v25 = vld [vmem:[#allocation12 + $0xc4] ss:$16 sps:$4 sm:$0xff]  }
  0xba   :  { %v1819_v26 = vld [vmem:[#allocation12 + $0xcc] ss:$16 sps:$4 sm:$0xff]   ;;  %v1821_v27 = vld [vmem:[#allocation12 + $0xc0] ss:$16 sps:$4 sm:$0xff]   ;;  %v1822_v28 = vld [vmem:[#allocation12 + $0xc8] ss:$16 sps:$4 sm:$0xff]  }
  0xbb   :  { %v1823_v29 = vld [vmem:[#allocation12 + $0xe4] ss:$16 sps:$4 sm:$0xff]   ;;  %v1825_v30 = vld [vmem:[#allocation12 + $0xec] ss:$16 sps:$4 sm:$0xff]   ;;  %v1827_v31 = vld [vmem:[#allocation12 + $0xe0] ss:$16 sps:$4 sm:$0xff]  }
  0xbc   :  { %413 = vmatpush1.bf16.msra.mxu0 %v1797_v11  ;;  %454 = vmatpush1.bf16.msra.mxu1 %v1798_v12  ;;  %v1828_v32 = vld [vmem:[#allocation12 + $0xe8] ss:$16 sps:$4 sm:$0xff]   ;;  %v1831_v33 = vld [vmem:[#allocation11 + $0x4] ss:$16 sps:$4 sm:$0xff]   ;;  %v1834_v34 = vld [vmem:[#allocation11 + $0xc] ss:$16 sps:$4 sm:$0xff]  }
  0xbd   :  { %414 = vmatprep.subr.bf16.mxu0 %v1799_v13  ;;  %455 = vmatprep.subr.bf16.mxu1 %v1801_v14  ;;  %v182_v35 = vld [vmem:[#allocation3] sm:$0xf]  ;;  %v1829_v36 = vld [vmem:[#allocation11] ss:$16 sps:$4 sm:$0xff]   ;;  %v1832_v37 = vld [vmem:[#allocation11 + $0x8] ss:$16 sps:$4 sm:$0xff]  }
  0xbe   :  { %v1837_v38 = vld [vmem:[#allocation11 + $0x24] ss:$16 sps:$4 sm:$0xff]   ;;  %v1840_v39 = vld [vmem:[#allocation11 + $0x2c] ss:$16 sps:$4 sm:$0xff]   ;;  %v1835_v40 = vld [vmem:[#allocation11 + $0x20] ss:$16 sps:$4 sm:$0xff]  }
  0xbf   :  { %v1838_v41 = vld [vmem:[#allocation11 + $0x28] ss:$16 sps:$4 sm:$0xff]   ;;  %v1843_v42 = vld [vmem:[#allocation11 + $0x44] ss:$16 sps:$4 sm:$0xff]   ;;  %v1846_v43 = vld [vmem:[#allocation11 + $0x4c] ss:$16 sps:$4 sm:$0xff]  }
  0xc0   :  { %415 = vmatpush1.bf16.msra.mxu0 %v1803_v15  ;;  %456 = vmatpush1.bf16.msra.mxu1 %v1804_v16  ;;  %v1841_v44 = vld [vmem:[#allocation11 + $0x40] ss:$16 sps:$4 sm:$0xff]   ;;  %v1844_v45 = vld [vmem:[#allocation11 + $0x48] ss:$16 sps:$4 sm:$0xff]   ;;  %v1849_v46 = vld [vmem:[#allocation11 + $0x64] ss:$16 sps:$4 sm:$0xff]  }
  0xc1   :  { %416 = vmatprep.subr.bf16.mxu0 %v1805_v17  ;;  %457 = vmatprep.subr.bf16.mxu1 %v1807_v18  ;;  %v1852_v47 = vld [vmem:[#allocation11 + $0x6c] ss:$16 sps:$4 sm:$0xff]   ;;  %v1847_v48 = vld [vmem:[#allocation11 + $0x60] ss:$16 sps:$4 sm:$0xff]   ;;  %v1850_v49 = vld [vmem:[#allocation11 + $0x68] ss:$16 sps:$4 sm:$0xff]  }
  0xc2   :  { %v1855_v50 = vld [vmem:[#allocation11 + $0x84] ss:$16 sps:$4 sm:$0xff]   ;;  %v1858_v51 = vld [vmem:[#allocation11 + $0x8c] ss:$16 sps:$4 sm:$0xff]   ;;  %v1853_v54 = vld [vmem:[#allocation11 + $0x80] ss:$16 sps:$4 sm:$0xff]  }
  0xc3   :  { %v1856_v55 = vld [vmem:[#allocation11 + $0x88] ss:$16 sps:$4 sm:$0xff]   ;;  %173 = vst [vmem:[#allocation2] sm:$0xf] %v172_v53  ;;  %v1861_v56 = vld [vmem:[#allocation11 + $0xa4] ss:$16 sps:$4 sm:$0xff]  }
  0xc4   :  { %417 = vmatpush1.bf16.msra.mxu0 %v1809_v19  ;;  %458 = vmatpush1.bf16.msra.mxu1 %v1810_v20  ;;  %v1864_v57 = vld [vmem:[#allocation11 + $0xac] ss:$16 sps:$4 sm:$0xff]   ;;  %v1859_v58 = vld [vmem:[#allocation11 + $0xa0] ss:$16 sps:$4 sm:$0xff]   ;;  %v1862_v59 = vld [vmem:[#allocation11 + $0xa8] ss:$16 sps:$4 sm:$0xff]  }
  0xc5   :  { %418 = vmatprep.subr.bf16.mxu0 %v1811_v21  ;;  %459 = vmatprep.subr.bf16.mxu1 %v1813_v22  ;;  %v1867_v60 = vld [vmem:[#allocation11 + $0xc4] ss:$16 sps:$4 sm:$0xff]   ;;  %v1870_v61 = vld [vmem:[#allocation11 + $0xcc] ss:$16 sps:$4 sm:$0xff]   ;;  %v1865_v62 = vld [vmem:[#allocation11 + $0xc0] ss:$16 sps:$4 sm:$0xff]  }
  0xc6   :  { %v1868_v63 = vld [vmem:[#allocation11 + $0xc8] ss:$16 sps:$4 sm:$0xff]   ;;  %v1873_v1 = vld [vmem:[#allocation11 + $0xe4] ss:$16 sps:$4 sm:$0xff]   ;;  %v1876_v2 = vld [vmem:[#allocation11 + $0xec] ss:$16 sps:$4 sm:$0xff]  }
  0xc7   :  { %v1871_v3 = vld [vmem:[#allocation11 + $0xe0] ss:$16 sps:$4 sm:$0xff]   ;;  %v1874_v4 = vld [vmem:[#allocation11 + $0xe8] ss:$16 sps:$4 sm:$0xff]   ;;  %v1879_v6 = vld [vmem:[#allocation15 + $0x4] ss:$16 sps:$4 sm:$0xff]  }
  0xc8   :  { %419 = vmatpush1.bf16.msra.mxu0 %v1815_v23  ;;  %460 = vmatpush1.bf16.msra.mxu1 %v1816_v24  ;;  %v1882_v7 = vld [vmem:[#allocation15 + $0xc] ss:$16 sps:$4 sm:$0xff]   ;;  %v1877_v8 = vld [vmem:[#allocation15] ss:$16 sps:$4 sm:$0xff]   ;;  %v1880_v9 = vld [vmem:[#allocation15 + $0x8] ss:$16 sps:$4 sm:$0xff]  }
  0xc9   :  { %420 = vmatprep.subr.bf16.mxu0 %v1817_v25  ;;  %461 = vmatprep.subr.bf16.mxu1 %v1819_v26  ;;  %v1885_v10 = vld [vmem:[#allocation15 + $0x24] ss:$16 sps:$4 sm:$0xff]   ;;  %v1888_v11 = vld [vmem:[#allocation15 + $0x2c] ss:$16 sps:$4 sm:$0xff]   ;;  %v1883_v12 = vld [vmem:[#allocation15 + $0x20] ss:$16 sps:$4 sm:$0xff]  }
  0xca   :  { %v183_v5 = vld [vmem:[#allocation2] sm:$0xf]  ;;  %v1886_v13 = vld [vmem:[#allocation15 + $0x28] ss:$16 sps:$4 sm:$0xff]   ;;  %v1891_v14 = vld [vmem:[#allocation15 + $0x44] ss:$16 sps:$4 sm:$0xff]  }
  0xcb   :  { %v1894_v15 = vld [vmem:[#allocation15 + $0x4c] ss:$16 sps:$4 sm:$0xff]   ;;  %v1889_v16 = vld [vmem:[#allocation15 + $0x40] ss:$16 sps:$4 sm:$0xff]   ;;  %v1892_v17 = vld [vmem:[#allocation15 + $0x48] ss:$16 sps:$4 sm:$0xff]  }
  0xcc   :  { %421 = vmatpush1.bf16.msra.mxu0 %v1821_v27  ;;  %462 = vmatpush1.bf16.msra.mxu1 %v1822_v28  ;;  %v1897_v18 = vld [vmem:[#allocation15 + $0x64] ss:$16 sps:$4 sm:$0xff]   ;;  %v1900_v19 = vld [vmem:[#allocation15 + $0x6c] ss:$16 sps:$4 sm:$0xff]   ;;  %v1895_v20 = vld [vmem:[#allocation15 + $0x60] ss:$16 sps:$4 sm:$0xff]  }
  0xcd   :  { %422 = vmatprep.subr.bf16.mxu0 %v1823_v29  ;;  %463 = vmatprep.subr.bf16.mxu1 %v1825_v30  ;;  %v1898_v21 = vld [vmem:[#allocation15 + $0x68] ss:$16 sps:$4 sm:$0xff]   ;;  %v1903_v22 = vld [vmem:[#allocation15 + $0x84] ss:$16 sps:$4 sm:$0xff]   ;;  %v1906_v23 = vld [vmem:[#allocation15 + $0x8c] ss:$16 sps:$4 sm:$0xff]  }
  0xce   :  { %v1901_v24 = vld [vmem:[#allocation15 + $0x80] ss:$16 sps:$4 sm:$0xff]   ;;  %v1904_v25 = vld [vmem:[#allocation15 + $0x88] ss:$16 sps:$4 sm:$0xff]   ;;  %v1909_v27 = vld [vmem:[#allocation15 + $0xa4] ss:$16 sps:$4 sm:$0xff]  }
  0xcf   :  { %v1907_v26 = vld [vmem:[#allocation15 + $0xa0] ss:$16 sps:$4 sm:$0xff]   ;;  %v1910_v28 = vld [vmem:[#allocation15 + $0xa8] ss:$16 sps:$4 sm:$0xff]   ;;  %v1912_v29 = vld [vmem:[#allocation15 + $0xac] ss:$16 sps:$4 sm:$0xff]  }
  0xd0   :  { %423 = vmatpush1.bf16.msra.mxu0 %v1827_v31  ;;  %464 = vmatpush1.bf16.msra.mxu1 %v1828_v32  ;;  %v1915_v30 = vld [vmem:[#allocation15 + $0xc4] ss:$16 sps:$4 sm:$0xff]   ;;  %v1918_v31 = vld [vmem:[#allocation15 + $0xcc] ss:$16 sps:$4 sm:$0xff]   ;;  %v1913_v32 = vld [vmem:[#allocation15 + $0xc0] ss:$16 sps:$4 sm:$0xff]  }
  0xd1   :  { %650 = vmatprep.subr.bf16.mxu0 %v1831_v33  ;;  %691 = vmatprep.subr.bf16.mxu1 %v1834_v34  ;;  %v1916_v33 = vld [vmem:[#allocation15 + $0xc8] ss:$16 sps:$4 sm:$0xff]   ;;  %v1921_v34 = vld [vmem:[#allocation15 + $0xe4] ss:$16 sps:$4 sm:$0xff]   ;;  %vm2356_vm0 = vmmov 0   ;;  %s2357_s19 = smov [#allocation19]  }
  0xd2   :  { %v732_v53 = vld [vmem:[%s2699_s7] sm:$0xf]  ;;  %s1531_s5 = sshll.u32 %s2357_s19, 4  ;;  %s2358_s30 = smov [#allocation22]   ;;  %s1532_s5 = int_to_ptr.vmem [resolvable:$true] %s1531_s5 }
  0xd3   :  { %441 = vmatmul.mubr.bf16.vlgmr.msra.gmra.mrb[0].mxu0 %v182_v35  ;;  %482 = vmatmul.mubr.bf16.vlgmr.msra.gmra.mrb[0].mxu1 %v182_v35  ;;  %v1924_v35 = vld [vmem:[#allocation15 + $0xec] ss:$16 sps:$4 sm:$0xff]   ;;  %s1551_s25 = sshll.u32 %s2358_s30, 4  ;;  %p2220_p3 = scmp.lt.s32.totalorder %s1532_s5, %s1532_s5  ;;  %s1552_s25 = int_to_ptr.vmem [resolvable:$true] %s1551_s25 }
  0xd4   :  { %651 = vmatpush1.bf16.msra.mxu0 %v1829_v36  ;;  %692 = vmatpush1.bf16.msra.mxu1 %v1832_v37  ;;  %v1919_v36 = vld [vmem:[#allocation15 + $0xe0] ss:$16 sps:$4 sm:$0xff]   ;;  %v1922_v37 = vld [vmem:[#allocation15 + $0xe8] ss:$16 sps:$4 sm:$0xff]  }
  0xd5   :  { %652 = vmatprep.subr.bf16.mxu0 %v1837_v38  ;;  %693 = vmatprep.subr.bf16.mxu1 %v1840_v39  ;;  %v1927_v38 = vld [vmem:[#allocation14 + $0x4] ss:$16 sps:$4 sm:$0xff]   ;;  %v1930_v39 = vld [vmem:[#allocation14 + $0xc] ss:$16 sps:$4 sm:$0xff]  }
  0xd6   :  { %682 = vmatprep.mubr.bf16.mxu0 %v2354_v0  ;;  %723 = vmatprep.mubr.bf16.mxu1 %v2354_v0 }
  0xd8   :  { %653 = vmatpush1.bf16.msra.mxu0 %v1835_v40  ;;  %694 = vmatpush1.bf16.msra.mxu1 %v1838_v41  ;;  %v176_v40 = vld [vmem:[%s2695_s3] sm:$0xff] }
  0xd9   :  { %654 = vmatprep.subr.bf16.mxu0 %v1843_v42  ;;  %695 = vmatprep.subr.bf16.mxu1 %v1846_v43  ;;  %v177_v41 = vpack.c.bf16 %v176_v40, %v176_v40  ;;  %v1939_v40 = vld [vmem:[#allocation14 + $0x44] ss:$16 sps:$4 sm:$0xff]  }
  0xdb   :  { %179 = vst [vmem:[#allocation2 + $0x4] sm:$0xf] %v177_v41  ;;  %v1942_v41 = vld [vmem:[#allocation14 + $0x4c] ss:$16 sps:$4 sm:$0xff]  }
  0xdc   :  { %655 = vmatpush1.bf16.msra.mxu0 %v1841_v44  ;;  %696 = vmatpush1.bf16.msra.mxu1 %v1844_v45 }
  0xdd   :  { %656 = vmatprep.subr.bf16.mxu0 %v1849_v46  ;;  %697 = vmatprep.subr.bf16.mxu1 %v1852_v47 }
  0xe0   :  { %657 = vmatpush1.bf16.msra.mxu0 %v1847_v48  ;;  %698 = vmatpush1.bf16.msra.mxu1 %v1850_v49 }
  0xe1   :  { %658 = vmatprep.subr.bf16.mxu0 %v1855_v50  ;;  %699 = vmatprep.subr.bf16.mxu1 %v1858_v51  ;;  %v734_v50 = vlaneseq }
  0xe3   :  { %v2595_v51 = vshrl.u32 %v734_v50, 7  ;;  %v1949_v50 = vld [vmem:[#allocation14 + $0x80] ss:$16 sps:$4 sm:$0xff]  }
  0xe4   :  { %659 = vmatpush1.bf16.msra.mxu0 %v1853_v54  ;;  %700 = vmatpush1.bf16.msra.mxu1 %v1856_v55 }
  0xe5   :  { %660 = vmatprep.subr.bf16.mxu0 %v1861_v56  ;;  %701 = vmatprep.subr.bf16.mxu1 %v1864_v57  ;;  %v736_v52 = vsub.s32 0, %v2595_v51  ;;  %v740_v54 = vsub.s32 1, %v2595_v51 }
  0xe7   :  { %v737_v55 = vrot.slane %v732_v53, %v736_v52 }
  0xe8   :  { %661 = vmatpush1.bf16.msra.mxu0 %v1859_v58  ;;  %702 = vmatpush1.bf16.msra.mxu1 %v1862_v59  ;;  %v741_v58 = vrot.slane %v732_v53, %v740_v54 }
  0xe9   :  { %662 = vmatprep.subr.bf16.mxu0 %v1867_v60  ;;  %703 = vmatprep.subr.bf16.mxu1 %v1870_v61 }
  0xec   :  { %663 = vmatpush1.bf16.msra.mxu0 %v1865_v62  ;;  %704 = vmatpush1.bf16.msra.mxu1 %v1868_v63 }
  0xed   :  { %664 = vmatprep.subr.bf16.mxu0 %v1873_v1  ;;  %705 = vmatprep.subr.bf16.mxu1 %v1876_v2 }
  0xf0   :  { %665 = vmatpush1.bf16.msra.mxu0 %v1871_v3  ;;  %706 = vmatpush1.bf16.msra.mxu1 %v1874_v4 }
  0xf1   :  { %1013 = vmatprep.subr.bf16.mxu0 %v1879_v6  ;;  %1054 = vmatprep.subr.bf16.mxu1 %v1882_v7 }
  0xf3   :  { %683 = vmatmul.mubr.bf16.vlgmr.msra.gmra.mrb[4].mxu0 %v183_v5  ;;  %724 = vmatmul.mubr.bf16.vlgmr.msra.gmra.mrb[4].mxu1 %v183_v5  ;;  %v744_v5 = vsub.s32 2, %v2595_v51 }
  0xf4   :  { %1045 = vmatprep.mubr.bf16.mxu0 %v2354_v0  ;;  %1086 = vmatprep.mubr.bf16.mxu1 %v2354_v0 }
  0xf5   :  { %1014 = vmatpush1.bf16.msra.mxu0 %v1877_v8  ;;  %1055 = vmatpush1.bf16.msra.mxu1 %v1880_v9 }
  0xf6   :  { %1015 = vmatprep.subr.bf16.mxu0 %v1885_v10  ;;  %1056 = vmatprep.subr.bf16.mxu1 %v1888_v11  ;;  %v745_v11 = vrot.slane %v732_v53, %v744_v5 }
  0xf9   :  { %1016 = vmatpush1.bf16.msra.mxu0 %v1883_v12  ;;  %1057 = vmatpush1.bf16.msra.mxu1 %v1886_v13  ;;  %v748_v12 = vsub.s32 3, %v2595_v51 }
  0xfa   :  { %1017 = vmatprep.subr.bf16.mxu0 %v1891_v14  ;;  %1058 = vmatprep.subr.bf16.mxu1 %v1894_v15 }
  0xfb   :  { %v749_v14 = vrot.slane %v732_v53, %v748_v12  ;;  %v1957_v53 = vld [vmem:[#allocation14 + $0xa4] ss:$16 sps:$4 sm:$0xff]  }
  0xfd   :  { %1018 = vmatpush1.bf16.msra.mxu0 %v1889_v16  ;;  %1059 = vmatpush1.bf16.msra.mxu1 %v1892_v17 }
  0xfe   :  { %1019 = vmatprep.subr.bf16.mxu0 %v1897_v18  ;;  %1060 = vmatprep.subr.bf16.mxu1 %v1900_v19 }
 0x101   :  { %1020 = vmatpush1.bf16.msra.mxu0 %v1895_v20  ;;  %1061 = vmatpush1.bf16.msra.mxu1 %v1898_v21  ;;  %v174_v21 = vld [vmem:[#allocation8] sm:$0xff] }
 0x102   :  { %1021 = vmatprep.subr.bf16.mxu0 %v1903_v22  ;;  %1062 = vmatprep.subr.bf16.mxu1 %v1906_v23 }
 0x105   :  { %1022 = vmatpush1.bf16.msra.mxu0 %v1901_v24  ;;  %1063 = vmatpush1.bf16.msra.mxu1 %v1904_v25 }
 0x106   :  { %1023 = vmatprep.subr.bf16.mxu0 %v1909_v27  ;;  %1064 = vmatprep.subr.bf16.mxu1 %v1912_v29 }
 0x109   :  { %1024 = vmatpush1.bf16.msra.mxu0 %v1907_v26  ;;  %1065 = vmatpush1.bf16.msra.mxu1 %v1910_v28 }
 0x10a   :  { %1025 = vmatprep.subr.bf16.mxu0 %v1915_v30  ;;  %1066 = vmatprep.subr.bf16.mxu1 %v1918_v31 }
 0x10d   :  { %1026 = vmatpush1.bf16.msra.mxu0 %v1913_v32  ;;  %1067 = vmatpush1.bf16.msra.mxu1 %v1916_v33  ;;  %v1925_v33 = vld [vmem:[#allocation14] ss:$16 sps:$4 sm:$0xff]  }
 0x10e   :  { %1027 = vmatprep.subr.bf16.mxu0 %v1921_v34  ;;  %1068 = vmatprep.subr.bf16.mxu1 %v1924_v35  ;;  %v1928_v34 = vld [vmem:[#allocation14 + $0x8] ss:$16 sps:$4 sm:$0xff]  }
 0x111   :  { %1028 = vmatpush1.bf16.msra.mxu0 %v1919_v36  ;;  %1069 = vmatpush1.bf16.msra.mxu1 %v1922_v37  ;;  %v1933_v36 = vld [vmem:[#allocation14 + $0x24] ss:$16 sps:$4 sm:$0xff]   ;;  %v1936_v37 = vld [vmem:[#allocation14 + $0x2c] ss:$16 sps:$4 sm:$0xff]  }
 0x112   :  { %1255 = vmatprep.subr.bf16.mxu0 %v1927_v38  ;;  %1296 = vmatprep.subr.bf16.mxu1 %v1930_v39  ;;  %v1931_v38 = vld [vmem:[#allocation14 + $0x20] ss:$16 sps:$4 sm:$0xff]   ;;  %v1934_v39 = vld [vmem:[#allocation14 + $0x28] ss:$16 sps:$4 sm:$0xff]  }
 0x1a6   :  { %v442_v42 = vpop.f32.mrb[0].mxu0  ;;  %v483_v43 = vpop.f32.mrb[0].mxu1 }
 0x1a7   :  { %v444_v44 = vpop.f32.mrb[1].mxu0  ;;  %v485_v45 = vpop.f32.mrb[1].mxu1 }
 0x1a8   :  { %v446_v46 = vpop.f32.mrb[2].mxu0  ;;  %v487_v47 = vpop.f32.mrb[2].mxu1 }
 0x1a9   :  { %v447_v48 = vpop.f32.mrb[3].mxu0  ;;  %v488_v49 = vpop.f32.mrb[3].mxu1  ;;  %v1943_v46 = vld [vmem:[#allocation14 + $0x60] ss:$16 sps:$4 sm:$0xff]   ;;  %v1946_v47 = vld [vmem:[#allocation14 + $0x68] ss:$16 sps:$4 sm:$0xff]  }
 0x1aa   :  { %v1951_v48 = vld [vmem:[#allocation14 + $0x84] ss:$16 sps:$4 sm:$0xff]   ;;  %v1954_v49 = vld [vmem:[#allocation14 + $0x8c] ss:$16 sps:$4 sm:$0xff]  }
 0x1c6   :  { %v684_v56 = vpop.f32.mrb[4].mxu0  ;;  %v725_v57 = vpop.f32.mrb[4].mxu1 }
 0x1c7   :  { %v685_v59 = vadd.f32 %v684_v56, %v442_v42  ;;  %v726_v60 = vadd.f32 %v725_v57, %v483_v43  ;;  %v686_v61 = vpop.f32.mrb[5].mxu0  ;;  %v727_v62 = vpop.f32.mrb[5].mxu1  ;;  %v1937_v42 = vld [vmem:[#allocation14 + $0x40] ss:$16 sps:$4 sm:$0xff]   ;;  %v1940_v43 = vld [vmem:[#allocation14 + $0x48] ss:$16 sps:$4 sm:$0xff]  }
 0x1c8   :  { %v687_v63 = vadd.f32 %v686_v61, %v444_v44  ;;  %v728_v1 = vadd.f32 %v727_v62, %v485_v45  ;;  %v688_v2 = vpop.f32.mrb[6].mxu0  ;;  %v729_v3 = vpop.f32.mrb[6].mxu1  ;;  %v1945_v44 = vld [vmem:[#allocation14 + $0x64] ss:$16 sps:$4 sm:$0xff]   ;;  %v1948_v45 = vld [vmem:[#allocation14 + $0x6c] ss:$16 sps:$4 sm:$0xff]  }
 0x1c9   :  { %v754_v4 = vadd.f32 %v737_v55, %v685_v59  ;;  %v689_v6 = vpop.f32.mrb[7].mxu0  ;;  %v730_v7 = vpop.f32.mrb[7].mxu1  ;;  %v756_v13 = vadd.f32 %v745_v11, %v726_v60  ;;  %v1960_v55 = vld [vmem:[#allocation14 + $0xac] ss:$16 sps:$4 sm:$0xff]   ;;  %v1955_v56 = vld [vmem:[#allocation14 + $0xa0] ss:$16 sps:$4 sm:$0xff]  }
 0x1ca   :  { %v755_v8 = vadd.f32 %v741_v58, %v687_v63  ;;  %v757_v17 = vadd.f32 %v749_v14, %v728_v1  ;;  %v1958_v57 = vld [vmem:[#allocation14 + $0xa8] ss:$16 sps:$4 sm:$0xff]   ;;  %v1963_v58 = vld [vmem:[#allocation14 + $0xc4] ss:$16 sps:$4 sm:$0xff]   ;;  %v1966_v59 = vld [vmem:[#allocation14 + $0xcc] ss:$16 sps:$4 sm:$0xff]  }
 0x1cb   :  { %v1652_v9 = vmul.f32 -1.442695, %v754_v4  ;;  %v1654_v15 = vmul.f32 -1.442695, %v756_v13  ;;  %v1961_v60 = vld [vmem:[#allocation14 + $0xc0] ss:$16 sps:$4 sm:$0xff]  }
 0x1cc   :  { %v1653_v10 = vmul.f32 -1.442695, %v755_v8  ;;  %v1964_v61 = vld [vmem:[#allocation14 + $0xc8] ss:$16 sps:$4 sm:$0xff]   ;;  %v1969_v62 = vld [vmem:[#allocation14 + $0xe4] ss:$16 sps:$4 sm:$0xff]  }
 0x1cd   :  { %1981 = vpow2.f32 %v1652_v9  ;;  %v1972_v63 = vld [vmem:[#allocation14 + $0xec] ss:$16 sps:$4 sm:$0xff]   ;;  %v1967_v1 = vld [vmem:[#allocation14 + $0xe0] ss:$16 sps:$4 sm:$0xff]   ;;  %v1970_v2 = vld [vmem:[#allocation14 + $0xe8] ss:$16 sps:$4 sm:$0xff]  }
 0x1ce   :  { %1983 = vpow2.f32 %v1653_v10  ;;  %v788_v3 = vld [vmem:[#allocation2 + $0x4] sm:$0xf]  ;;  %v2355_v6 = vmov 0.0   ;;  %v1974_v7 = vld [vmem:[#allocation17 + $0x8] sm:$0xff]   ;;  %v1975_v8 = vld [vmem:[#allocation17 + $0x10] sm:$0xff]  }
 0x1cf   :  { %1985 = vpow2.f32 %v1654_v15  ;;  %v1973_v4 = vld [vmem:[#allocation17] sm:$0xff]   ;;  %v1976_v9 = vld [vmem:[#allocation17 + $0x18] sm:$0xff]   ;;  %v1978_v11 = vld [vmem:[#allocation17 + $0x28] sm:$0xff]  }
 0x1d0   :  { %v1977_v10 = vld [vmem:[#allocation17 + $0x20] sm:$0xff]   ;;  %v1979_v13 = vld [vmem:[#allocation17 + $0x30] sm:$0xff]   ;;  %v1980_v14 = vld [vmem:[#allocation17 + $0x38] sm:$0xff]  }
 0x1d7   :  { %v1982_v16 = vpop.eup %1981 }
 0x1d8   :  { %v767_v18 = vadd.f32 1.0, %v1982_v16  ;;  %v1984_v19 = vpop.eup %1983 }
 0x1d9   :  { %v768_v20 = vadd.f32 1.0, %v1984_v19  ;;  %v1986_v22 = vpop.eup %1985 }
 0x1da   :  { %1987 = vrcp.f32 %v767_v18  ;;  %v769_v27 = vadd.f32 1.0, %v1986_v22 }
 0x1db   :  { %1989 = vtanh.f32 %v757_v17 }
 0x1dc   :  { %1991 = vrcp.f32 %v768_v20 }
 0x1dd   :  { %1993 = vrcp.f32 %v769_v27 }
 0x1e4   :  { %v1988_v23 = vpop.eup %1987 }
 0x1e5   :  { %v1990_v24 = vpop.eup %1989  ;;  %v778_v25 = vmul.f32 %v1988_v23, %v174_v21  ;;  %v1337_v23 = vld [vmem:[%s2702_s10] sm:$0xf] }
 0x1e6   :  { %v1992_v26 = vpop.eup %1991  ;;  %v1346_v27 = vrot.slane %v1337_v23, %v740_v54 }
 0x1e7   :  { %v779_v28 = vmul.f32 %v1992_v26, %v1990_v24  ;;  %v1994_v30 = vpop.eup %1993  ;;  %v1342_v24 = vrot.slane %v1337_v23, %v736_v52  ;;  %v1350_v52 = vrot.slane %v1337_v23, %v744_v5 }
 0x1e9   :  { %v780_v29 = vadd.f32 %v779_v28, %v778_v25 }
 0x1eb   :  { %1995 = vtanh.f32 %v780_v29  ;;  %783 = vst [vmem:[#allocation21] sm:$0xff] %v780_v29 }
 0x1f5   :  { %v1996_v31 = vpop.eup %1995 }
 0x1f6   :  { %v782_v32 = vmul.f32 %v1996_v31, %v1994_v30 }
 0x1f8   :  { %v785_v35 = vpack.c.bf16 %v782_v32, %v782_v32  ;;  %784 = vst [vmem:[#allocation19] sm:$0xff] %v782_v32 }
 0x1fa   :  { %786 = vst [vmem:[#allocation2] sm:$0xf] %v785_v35  ;;  %1046 = vmatmul.mubr.bf16.vlgmr.msra.gmra.mrb[8].mxu0 %v785_v35  ;;  %1087 = vmatmul.mubr.bf16.vlgmr.msra.gmra.mrb[8].mxu1 %v785_v35 }
 0x1fb   :  { %1256 = vmatpush1.bf16.msra.mxu0 %v1925_v33  ;;  %1297 = vmatpush1.bf16.msra.mxu1 %v1928_v34 }
 0x1fc   :  { %1257 = vmatprep.subr.bf16.mxu0 %v1933_v36  ;;  %1298 = vmatprep.subr.bf16.mxu1 %v1936_v37 }
 0x1fd   :  { %1287 = vmatprep.mubr.bf16.mxu0 %v2354_v0  ;;  %1328 = vmatprep.mubr.bf16.mxu1 %v2354_v0  ;;  %v1952_v0 = vld [vmem:[#allocation14 + $0x88] ss:$16 sps:$4 sm:$0xff]  }
 0x1ff   :  { %1258 = vmatpush1.bf16.msra.mxu0 %v1931_v38  ;;  %1299 = vmatpush1.bf16.msra.mxu1 %v1934_v39 }
 0x200   :  { %1259 = vmatprep.subr.bf16.mxu0 %v1939_v40  ;;  %1300 = vmatprep.subr.bf16.mxu1 %v1942_v41 }
 0x203   :  { %1260 = vmatpush1.bf16.msra.mxu0 %v1937_v42  ;;  %1301 = vmatpush1.bf16.msra.mxu1 %v1940_v43  ;;  %v1354_v42 = vrot.slane %v1337_v23, %v748_v12 }
 0x204   :  { %1261 = vmatprep.subr.bf16.mxu0 %v1945_v44  ;;  %1302 = vmatprep.subr.bf16.mxu1 %v1948_v45 }
 0x207   :  { %1262 = vmatpush1.bf16.msra.mxu0 %v1943_v46  ;;  %1303 = vmatpush1.bf16.msra.mxu1 %v1946_v47 }
 0x208   :  { %1263 = vmatprep.subr.bf16.mxu0 %v1951_v48  ;;  %1304 = vmatprep.subr.bf16.mxu1 %v1954_v49  ;;  %v180_v49 = vld [vmem:[#allocation9] sm:$0xff] }
 0x20b   :  { %1264 = vmatpush1.bf16.msra.mxu0 %v1949_v50  ;;  %1305 = vmatpush1.bf16.msra.mxu1 %v1952_v0 }
 0x20c   :  { %1265 = vmatprep.subr.bf16.mxu0 %v1957_v53  ;;  %1306 = vmatprep.subr.bf16.mxu1 %v1960_v55 }
 0x20f   :  { %1266 = vmatpush1.bf16.msra.mxu0 %v1955_v56  ;;  %1307 = vmatpush1.bf16.msra.mxu1 %v1958_v57 }
 0x210   :  { %1267 = vmatprep.subr.bf16.mxu0 %v1963_v58  ;;  %1308 = vmatprep.subr.bf16.mxu1 %v1966_v59 }
 0x213   :  { %1268 = vmatpush1.bf16.msra.mxu0 %v1961_v60  ;;  %1309 = vmatpush1.bf16.msra.mxu1 %v1964_v61  ;;  %v1722_v61 = vld [vmem:[%s2704_s12] ss:$0 sm:$0xff]  ;;  %s2215_s12 = scalar_lea.vmem %s1532_s5, 128 }
 0x214   :  { %1269 = vmatprep.subr.bf16.mxu0 %v1969_v62  ;;  %1310 = vmatprep.subr.bf16.mxu1 %v1972_v63  ;;  %p2216_p2 = scmp.ne.s32.totalorder %s1532_s5, %s2215_s12  ;;  %p2221_p4 = scmp.lt.s32.totalorder %s2215_s12, %s2215_s12 }
 0x216   :  { %p2222_p5 = por %p2221_p4, %p2220_p3 }
 0x217   :  { %1270 = vmatpush1.bf16.msra.mxu0 %v1967_v1  ;;  %1311 = vmatpush1.bf16.msra.mxu1 %v1970_v2 }
 0x218   :  { %1740 = vmatprep.subr.bf16.mxu0 %v2355_v6  ;;  %p2223_p6 = pnand %p2222_p5, %p2216_p2 }
 0x21a   :  { %1288 = vmatmul.mubr.bf16.vlgmr.msra.gmra.mrb[12].mxu0 %v788_v3  ;;  %1329 = vmatmul.mubr.bf16.vlgmr.msra.gmra.mrb[12].mxu1 %v788_v3 }
 0x21b   :  { %1741 = vmatpush3.bf16.msra.mxu0 %v1973_v4  ;;  %1756 = vmatprep.mubr.msk.bf16.mxu0 %vm2356_vm0, %v2355_v6 }
 0x21c   :  { %1742 = vmatprep.subr.bf16.mxu0 %v2355_v6 }
 0x21f   :  { %1743 = vmatpush3.bf16.msra.mxu0 %v1974_v7 }
 0x220   :  { %1744 = vmatprep.subr.bf16.mxu0 %v2355_v6 }
 0x223   :  { %1745 = vmatpush3.bf16.msra.mxu0 %v1975_v8 }
 0x224   :  { %1746 = vmatprep.subr.bf16.mxu0 %v2355_v6 }
 0x227   :  { %1747 = vmatpush3.bf16.msra.mxu0 %v1976_v9 }
 0x228   :  { %1748 = vmatprep.subr.bf16.mxu0 %v2355_v6 }
 0x22b   :  { %1749 = vmatpush3.bf16.msra.mxu0 %v1977_v10 }
 0x22c   :  { %1750 = vmatprep.subr.bf16.mxu0 %v2355_v6 }
 0x22f   :  { %1751 = vmatpush3.bf16.msra.mxu0 %v1978_v11 }
 0x230   :  { %1752 = vmatprep.subr.bf16.mxu0 %v2355_v6 }
 0x233   :  { %1753 = vmatpush3.bf16.msra.mxu0 %v1979_v13 }
 0x234   :  { %1754 = vmatprep.subr.bf16.mxu0 %v2355_v6 }
 0x237   :  { %1755 = vmatpush3.bf16.msra.mxu0 %v1980_v14 }
 0x2cd   :  { %v1047_v15 = vpop.f32.mrb[8].mxu0  ;;  %v1088_v16 = vpop.f32.mrb[8].mxu1 }
 0x2ce   :  { %v1049_v17 = vpop.f32.mrb[9].mxu0  ;;  %v1090_v18 = vpop.f32.mrb[9].mxu1 }
 0x2cf   :  { %v1051_v19 = vpop.f32.mrb[10].mxu0  ;;  %v1092_v20 = vpop.f32.mrb[10].mxu1 }
 0x2d0   :  { %v1052_v21 = vpop.f32.mrb[11].mxu0  ;;  %v1093_v22 = vpop.f32.mrb[11].mxu1 }
 0x2ed   :  { %v1289_v25 = vpop.f32.mrb[12].mxu0  ;;  %v1330_v26 = vpop.f32.mrb[12].mxu1 }
 0x2ee   :  { %v1290_v28 = vadd.f32 %v1289_v25, %v1047_v15  ;;  %v1331_v29 = vadd.f32 %v1330_v26, %v1088_v16  ;;  %v1291_v30 = vpop.f32.mrb[13].mxu0  ;;  %v1332_v31 = vpop.f32.mrb[13].mxu1 }
 0x2ef   :  { %v1292_v32 = vadd.f32 %v1291_v30, %v1049_v17  ;;  %v1333_v33 = vadd.f32 %v1332_v31, %v1090_v18  ;;  %v1293_v34 = vpop.f32.mrb[14].mxu0  ;;  %v1334_v35 = vpop.f32.mrb[14].mxu1 }
 0x2f0   :  { %v1359_v36 = vadd.f32 %v1342_v24, %v1290_v28  ;;  %v1294_v37 = vpop.f32.mrb[15].mxu0  ;;  %v1335_v38 = vpop.f32.mrb[15].mxu1  ;;  %v1361_v54 = vadd.f32 %v1350_v52, %v1331_v29 }
 0x2f1   :  { %v1360_v39 = vadd.f32 %v1346_v27, %v1292_v32  ;;  %v1362_v45 = vadd.f32 %v1354_v42, %v1333_v33 }
 0x2f2   :  { %v1719_v40 = vmul.f32 -1.442695, %v1359_v36  ;;  %v1721_v43 = vmul.f32 -1.442695, %v1361_v54 }
 0x2f3   :  { %v1720_v41 = vmul.f32 -1.442695, %v1360_v39 }
 0x2f4   :  { %1997 = vpow2.f32 %v1719_v40 }
 0x2f5   :  { %1999 = vpow2.f32 %v1720_v41 }
 0x2f6   :  { %2001 = vpow2.f32 %v1721_v43 }
 0x2fe   :  { %v1998_v44 = vpop.eup %1997 }
 0x2ff   :  { %v1372_v46 = vadd.f32 1.0, %v1998_v44  ;;  %v2000_v47 = vpop.eup %1999 }
 0x300   :  { %v1373_v48 = vadd.f32 1.0, %v2000_v47  ;;  %v2002_v50 = vpop.eup %2001 }
 0x301   :  { %2003 = vrcp.f32 %v1372_v46  ;;  %v1374_v56 = vadd.f32 1.0, %v2002_v50 }
 0x302   :  { %2005 = vtanh.f32 %v1362_v45 }
 0x303   :  { %2007 = vrcp.f32 %v1373_v48 }
 0x304   :  { %2009 = vrcp.f32 %v1374_v56 }
 0x30b   :  { %v2004_v0 = vpop.eup %2003 }
 0x30c   :  { %v2006_v53 = vpop.eup %2005  ;;  %v1383_v5 = vmul.f32 %v2004_v0, %v180_v49 }
 0x30d   :  { %v2008_v55 = vpop.eup %2007 }
 0x30e   :  { %v1384_v57 = vmul.f32 %v2008_v55, %v2006_v53  ;;  %v2010_v12 = vpop.eup %2009 }
 0x310   :  { %v1385_v51 = vadd.f32 %v1384_v57, %v1383_v5 }
 0x312   :  { %2011 = vtanh.f32 %v1385_v51  ;;  %1388 = vst [vmem:[#allocation24] sm:$0xff] %v1385_v51 }
 0x31c   :  { %v2012_v58 = vpop.eup %2011 }
 0x31d   :  { %v1387_v59 = vmul.f32 %v2012_v58, %v2010_v12 }
 0x31f   :  { %v1390_v60 = vpack.c.bf16 %v1387_v59, %v1387_v59  ;;  %1389 = vst [vmem:[#allocation22] sm:$0xff] %v1387_v59 }
 0x321   :  { %1391 = vst [vmem:[#allocation2 + $0x4] sm:$0xf] %v1390_v60  ;;  %1757 = vmatmul.mubr.bf16.vlgmr.msra.gmra.mrb[16].mxu0 %v1390_v60 }
 0x3f4   :  { %v1497_v62 = vpop.f32.mrb[16].mxu0 }
 0x3f5   :  { %v1498_v63 = vadd.f32 %v1722_v61, %v1497_v62  ;;  %v1758_v1 = vpop.f32.mrb[17].mxu0 }
 0x3f6   :  { %v1500_v2 = vpop.f32.mrb[18].mxu0 }
 0x3f7   :  { %v1503_v3 = vmul.f32 1.25, %v1498_v63  ;;  %v1759_v4 = vpop.f32.mrb[19].mxu0 }
 0x3f9   :  { %1504 = vmax.xlane.f32.xlu0 %v1503_v3 }
 0x486   :  { %v1505_v6 = vpop.xlane.xlu0 %1504 }
 0x487   :  { %v2628_v7 = vsub.f32 %v1503_v3, %v1505_v6 }
 0x489   :  { %v1507_v8 = vmul.f32 1.442695, %v2628_v7 }
 0x48b   :  { %2013 = vpow2.f32 %v1507_v8 }
 0x495   :  { %v2014_v9 = vpop.eup %2013 }
 0x496   :  { %1509 = vadd.xlane.f32.xlu0 %v2014_v9 }
 0x497   :  { %2226 = shalt.err (!%p2223_p6)
}
 0x498   :  { %s2227_s26 = scalar_lea.hbm %s2706_s14, 128 }
 0x499   :  { %p2228_p7 = scmp.ne.s32.totalorder %s2706_s14, %s2227_s26  ;;  %p2231_p8 = scmp.lt.u32.totalorder %s2227_s26, %s2706_s14 }
 0x49b   :  { %p2233_p9 = pnand %p2231_p8, %p2228_p7 }
 0x49d   :  { %2236 = shalt.err (!%p2233_p9)
}
 0x49e   :  { %1534 = dma.vmem_to_hbm [thread:$0]  %s1532_s5, 128, %s2706_s14, [#allocation20]  }
 0x49f   :  { %s2237_s8 = scalar_lea.vmem %s1552_s25, 128  ;;  %p2242_p11 = scmp.lt.s32.totalorder %s1552_s25, %s1552_s25 }
 0x4a0   :  { %p2238_p10 = scmp.ne.s32.totalorder %s1552_s25, %s2237_s8  ;;  %p2243_p12 = scmp.lt.s32.totalorder %s2237_s8, %s2237_s8 }
 0x4a2   :  { %p2244_p13 = por %p2243_p12, %p2242_p11 }
 0x4a4   :  { %p2245_p0 = pnand %p2244_p13, %p2238_p10 }
 0x4a6   :  { %2248 = shalt.err (!%p2245_p0)
}
 0x4a7   :  { %s2249_s23 = scalar_lea.hbm %s2708_s16, 128 }
 0x4a8   :  { %p2250_p1 = scmp.ne.s32.totalorder %s2708_s16, %s2249_s23  ;;  %p2253_p2 = scmp.lt.u32.totalorder %s2249_s23, %s2708_s16 }
 0x4aa   :  { %p2255_p3 = pnand %p2253_p2, %p2250_p1 }
 0x4ac   :  { %2258 = shalt.err (!%p2255_p3)
}
 0x4ad   :  { %1554 = dma.vmem_to_hbm [thread:$0]  %s1552_s25, 128, %s2708_s16, [#allocation23]  }
 0x4ae   :  { %s2359_s7 = smov [#allocation21]  }
 0x4af   :  { %s1541_s10 = sshll.u32 %s2359_s7, 4  ;;  %s1542_s10 = int_to_ptr.vmem [resolvable:$true] %s1541_s10 }
 0x4b0   :  { %s2259_s21 = scalar_lea.vmem %s1542_s10, 128  ;;  %p2264_p5 = scmp.lt.s32.totalorder %s1542_s10, %s1542_s10 }
 0x4b1   :  { %p2260_p4 = scmp.ne.s32.totalorder %s1542_s10, %s2259_s21  ;;  %p2265_p6 = scmp.lt.s32.totalorder %s2259_s21, %s2259_s21 }
 0x4b3   :  { %p2266_p7 = por %p2265_p6, %p2264_p5 }
 0x4b5   :  { %p2267_p8 = pnand %p2266_p7, %p2260_p4 }
 0x4b7   :  { %2270 = shalt.err (!%p2267_p8)
}
 0x4b8   :  { %s2271_s30 = scalar_lea.hbm %s2707_s15, 128 }
 0x4b9   :  { %p2272_p9 = scmp.ne.s32.totalorder %s2707_s15, %s2271_s30  ;;  %p2275_p10 = scmp.lt.u32.totalorder %s2271_s30, %s2707_s15 }
 0x4bb   :  { %p2277_p11 = pnand %p2275_p10, %p2272_p9 }
 0x4bd   :  { %2280 = shalt.err (!%p2277_p11)
}
 0x4be   :  { %1544 = dma.vmem_to_hbm [thread:$0]  %s1542_s10, 128, %s2707_s15, [#allocation20]  }
 0x4bf   :  { %s2360_s2 = smov [#allocation24]  }
 0x4c0   :  { %s1561_s0 = sshll.u32 %s2360_s2, 4  ;;  %s1562_s0 = int_to_ptr.vmem [resolvable:$true] %s1561_s0 }
 0x4c1   :  { %s2281_s28 = scalar_lea.vmem %s1562_s0, 128  ;;  %p2286_p13 = scmp.lt.s32.totalorder %s1562_s0, %s1562_s0 }
 0x4c2   :  { %p2282_p12 = scmp.ne.s32.totalorder %s1562_s0, %s2281_s28  ;;  %p2287_p0 = scmp.lt.s32.totalorder %s2281_s28, %s2281_s28 }
 0x4c4   :  { %p2288_p1 = por %p2287_p0, %p2286_p13 }
 0x4c6   :  { %p2289_p2 = pnand %p2288_p1, %p2282_p12 }
 0x4c8   :  { %2292 = shalt.err (!%p2289_p2)
}
 0x4c9   :  { %s2293_s24 = scalar_lea.hbm %s2709_s17, 128 }
 0x4ca   :  { %p2294_p3 = scmp.ne.s32.totalorder %s2709_s17, %s2293_s24  ;;  %p2297_p4 = scmp.lt.u32.totalorder %s2293_s24, %s2709_s17 }
 0x4cc   :  { %p2299_p5 = pnand %p2297_p4, %p2294_p3 }
 0x4ce   :  { %2302 = shalt.err (!%p2299_p5)
}
 0x4cf   :  { %1564 = dma.vmem_to_hbm [thread:$0]  %s1562_s0, 128, %s2709_s17, [#allocation23]  }
 0x4d0   :  { %s2361_s18 = smov [#allocation18]  }
 0x4d1   :  { %s1521_s9 = sshll.u32 %s2361_s18, 4  ;;  %s1522_s9 = int_to_ptr.vmem [resolvable:$true] %s1521_s9 }
 0x4d2   :  { %s2303_s6 = scalar_lea.vmem %s1522_s9, 128  ;;  %p2308_p7 = scmp.lt.s32.totalorder %s1522_s9, %s1522_s9 }
 0x4d3   :  { %p2304_p6 = scmp.ne.s32.totalorder %s1522_s9, %s2303_s6  ;;  %p2309_p8 = scmp.lt.s32.totalorder %s2303_s6, %s2303_s6 }
 0x4d5   :  { %p2310_p9 = por %p2309_p8, %p2308_p7 }
 0x4d7   :  { %p2311_p10 = pnand %p2310_p9, %p2304_p6 }
 0x523   :  { %v1510_v10 = vpop.xlane.xlu0 %1509 }
 0x524   :  { %2015 = vlog2.f32 %v1510_v10 }
 0x52e   :  { %v2016_v11 = vpop.eup %2015 }
 0x52f   :  { %v1512_v13 = vmul.f32 0.6931472, %v2016_v11 }
 0x531   :  { %v1513_v14 = vsub.f32 %v2628_v7, %v1512_v13 }
 0x533   :  { %1514 = vst [vmem:[#allocation18] sm:$0xff] %v1513_v14 }
 0x534   :  { %2314 = shalt.err (!%p2311_p10)
}
 0x535   :  { %s2315_s17 = scalar_lea.hbm %s2705_s13, 128 }
 0x536   :  { %p2316_p11 = scmp.ne.s32.totalorder %s2705_s13, %s2315_s17  ;;  %p2319_p12 = scmp.lt.u32.totalorder %s2315_s17, %s2705_s13 }
 0x538   :  { %p2321_p13 = pnand %p2319_p12, %p2316_p11 }
 0x53a   :  { %2324 = shalt.err (!%p2321_p13)
}
 0x53b   :  { %1524 = dma.vmem_to_hbm [thread:$0]  %s1522_s9, 128, %s2705_s13, [#allocation5]  }
 0x53c   :  { %2335 = dma.done.wait [#allocation5], 128  }
 0x53d   :  { %2336 = vsyncadd [#allocation5], 4294967168 }
 0x53e   :  { %2337 = dma.done.wait [#allocation20], 256  }
 0x53f   :  { %2338 = vsyncadd [#allocation20], 4294967040 }
 0x540   :  { %2339 = dma.done.wait [#allocation23], 256  }
 0x541   :  { %2340 = vsyncadd [#allocation23], 4294967040 }
 0x542   :  { %1580 = vsyncpa [#allocation4], 1 }
 0x543   :  { %1581 = vsyncpa [#allocation7], 1 }
 0x544   :  { %1582 = vsyncpa [#allocation10], 1 }
 0x545   :  { %1583 = vsyncpa [#allocation13], 1 }
 0x546   :  { %1584 = vsyncpa [#allocation16], 1 }
 0x547   :  { %1585 = vsyncpa [#allocation5], 1 }
 0x548   :  { %1586 = vsyncpa [#allocation20], 1 }
 0x549   :  { %1587 = vsyncpa [#allocation23], 1 }

</bundles_post_ra>
